<compile_context>
chip_gen: v5e
topology: v5e:2x2
jax: 0.10.0
libtpu: 0.0.40
codegen_flags: <defaults>
</compile_context>

<pallas_src>
import jax
import jax.numpy as jnp
import numpy as np
from jax.experimental import pallas as pl
from jax.experimental.pallas import tpu as pltpu


def _round_up(x, m):
    return (x + m - 1) // m * m


def _make_tap_masks(n, h, w):
    """(9, N*H*W) float32 validity masks, tap order k = (dh+1)*3 + (dw+1)."""
    m = n * h * w
    p = np.arange(m)
    hh = (p // w) % h
    ww = p % w
    rows = []
    for dh in (-1, 0, 1):
        for dw in (-1, 0, 1):
            ok = (hh + dh >= 0) & (hh + dh < h) & (ww + dw >= 0) & (ww + dw < w)
            rows.append(ok.astype(np.float32))
    return jnp.asarray(np.stack(rows, axis=0))


def _segment_layout(num_convs, c0, growth):
    """8-aligned segment offsets in the resident (C_buf, M) buffer.

    Rows 0:c0 hold x, rows c0:c0_pad are permanent zeros, layer li's output
    starts at seg_off[li] (a multiple of 8).  Layer li's input is rows
    0:seg_off[li].
    """
    c0_pad = _round_up(c0, 8)
    growth_pad = _round_up(growth, 8)
    seg_off = [c0_pad + i * growth_pad for i in range(num_convs)]
    c_buf = seg_off[-1] + growth                     # no trailing pad needed
    return c0_pad, growth_pad, seg_off, c_buf


def _make_dense_block_kernel(num_convs, c0, growth, N, H, W, eps):
    """Build the fused DenseBlock kernel for a fixed static configuration."""
    M = N * H * W
    c0_pad, growth_pad, seg_off, c_buf = _segment_layout(num_convs, c0, growth)
    inv_m = 1.0 / M

    def kernel(x_ref, masks_ref, *rest):
        patches_ref = rest[-1]       # VMEM scratch, reused across layers
        o_ref = rest[-2]             # (c_buf, M): resident activation buffer
        layer_refs = rest[:-2]       # 4 refs per layer: gamma, beta, w, bias

        # Prologue: x arrives pre-padded to c0_pad rows (pad rows are zero),
        # so this is one aligned full-tile store.  No full-buffer memset.
        o_ref[0:c0_pad, :] = x_ref[...]

        # Zero inter-segment pad gaps that later layers will read
        # (no-op when growth % 8 == 0).
        for li in range(num_convs - 1):
            lo = seg_off[li] + growth
            hi = seg_off[li] + growth_pad
            if hi > lo:
                o_ref[lo:hi, :] = jnp.zeros((hi - lo, M), jnp.float32)

        for li in range(num_convs):
            g_ref, be_ref, w_ref, bi_ref = layer_refs[4 * li:4 * li + 4]
            cin_buf = seg_off[li]                      # 8-aligned input rows

            a_in = o_ref[0:cin_buf, :]                 # (cin_buf, M)

            # One-pass BatchNorm2d training-mode stats over N,H,W (lane axis):
            # mean = E[x], var = E[x^2] - mean^2 (biased), then affine + ReLU.
            mean = jnp.sum(a_in, axis=1, keepdims=True) * inv_m
            ex2 = jnp.sum(a_in * a_in, axis=1, keepdims=True) * inv_m
            var = ex2 - mean * mean
            scale = g_ref[...] * jax.lax.rsqrt(var + eps)
            shift = be_ref[...] - mean * scale
            act = jnp.maximum(a_in * scale + shift, 0.0)   # (cin_buf, M)

            # im2col: 9 lane-rotated taps (XLU roll, circular wrap is always
            # masked away), stored straight into the reused patches scratch at
            # 8-aligned sublane offsets.
            k = 0
            for dh in (-1, 0, 1):
                for dw in (-1, 0, 1):
                    off = dh * W + dw
                    if off == 0:
                        tap = act
                    else:
                        # want tap[:, p] = act[:, (p + off) % M]  ->  roll by -off
                        tap = pltpu.roll(act, shift=(-off) % M, axis=1)
                        tap = tap * masks_ref[k:k + 1, :]
                    patches_ref[k * cin_buf:(k + 1) * cin_buf, :] = tap
                    k += 1

            # Whole-layer 3x3 conv as one MXU matmul:
            # (growth, 9*cin_buf) @ (9*cin_buf, M) -> lane-dense (growth, M).
            # TODO(synk): feed bf16 operands here on v6e/v7x at scale (re-check
            #             tolerance); keep the f32 accumulator either way.
            y = jnp.dot(w_ref[...], patches_ref[0:9 * cin_buf, :],
                        preferred_element_type=jnp.float32) + bi_ref[...]

            # "Channel concat" = aligned store of the new channels.
            o_ref[seg_off[li]:seg_off[li] + growth, :] = y

    return kernel


def dense_block_forward(x_nchw, params, eps=1e-5):
    """DenseBlock forward. x_nchw: (N, C, H, W) float32. Returns NCHW."""
    N, c0, H, W = x_nchw.shape
    num_convs = len(params)
    growth = params[0][2].shape[-1]
    M = N * H * W
    c0_pad, growth_pad, seg_off, c_buf = _segment_layout(num_convs, c0, growth)

    # Channels on sublanes, flattened (n,h,w) on lanes.  Pad C up to a
    # multiple of 8 so the kernel prologue is one aligned full-tile store.
    x2d = jnp.transpose(x_nchw, (1, 0, 2, 3)).reshape(c0, M).astype(jnp.float32)
    x2d = jnp.pad(x2d, ((0, c0_pad - c0), (0, 0)))
    masks = _make_tap_masks(N, H, W)                        # (9, M)

    inputs = [x2d, masks]
    for li, (gamma, beta, w_hwio, bias) in enumerate(params):
        cin_buf = seg_off[li]

        def scatter_rows(vec_c):
            """Place logical per-channel values at their buffer-row positions."""
            out = jnp.zeros((cin_buf,), jnp.float32)
            out = out.at[0:c0].set(vec_c[0:c0])
            for j in range(li):
                dst = c0_pad + j * growth_pad
                src = c0 + j * growth
                out = out.at[dst:dst + growth].set(vec_c[src:src + growth])
            return out

        g = scatter_rows(gamma.astype(jnp.float32)).reshape(cin_buf, 1)
        b = scatter_rows(beta.astype(jnp.float32)).reshape(cin_buf, 1)

        # Weights: (kh, kw, cin, cout) scattered to buffer rows (zero on pad
        # rows), then (cout, kh*3*cin_buf + kw*cin_buf + row) to match the
        # tap ordering used when building patches.
        wp = jnp.zeros((3, 3, cin_buf, growth), jnp.float32)
        wp = wp.at[:, :, 0:c0, :].set(w_hwio[:, :, 0:c0, :].astype(jnp.float32))
        for j in range(li):
            dst = c0_pad + j * growth_pad
            src = c0 + j * growth
            wp = wp.at[:, :, dst:dst + growth, :].set(
                w_hwio[:, :, src:src + growth, :].astype(jnp.float32))
        wt = jnp.transpose(wp, (3, 0, 1, 2)).reshape(growth, 9 * cin_buf)

        inputs += [g, b, wt, bias.astype(jnp.float32).reshape(growth, 1)]

    kernel = _make_dense_block_kernel(num_convs, c0, growth, N, H, W, eps)
    patches_rows = 9 * seg_off[-1]                 # largest layer's im2col

    out_buf = pl.pallas_call(
        kernel,
        out_shape=jax.ShapeDtypeStruct((c_buf, M), jnp.float32),
        in_specs=[pl.BlockSpec(memory_space=pltpu.MemorySpace.VMEM)
                  for _ in inputs],
        out_specs=pl.BlockSpec(memory_space=pltpu.MemorySpace.VMEM),
        scratch_shapes=[pltpu.VMEM((patches_rows, M), jnp.float32)],
    )(*inputs)

    # Drop pad rows -> compact (c_total, M) -> (N, c_total, H, W).
    segs = [out_buf[0:c0]] + [out_buf[o:o + growth] for o in seg_off]
    out2d = jnp.concatenate(segs, axis=0)
    c_total = c0 + growth * num_convs
    return jnp.transpose(out2d.reshape(c_total, N, H, W), (1, 0, 2, 3))


def make_params(key, num_convs, input_channels, num_channels):
    """Deterministic parameters matching the PyTorch module's shapes."""
    params = []
    for i in range(num_convs):
        cin = num_channels * i + input_channels
        cout = num_channels
        key, kw, kb = jax.random.split(key, 3)
        gamma = jnp.ones((cin,), jnp.float32)   # BN weight init
        beta = jnp.zeros((cin,), jnp.float32)   # BN bias init
        w = 0.1 * jax.random.normal(kw, (3, 3, cin, cout), jnp.float32)  # HWIO
        b = 0.01 * jax.random.normal(kb, (cout,), jnp.float32)
        params.append((gamma, beta, w, b))
    return params


def _reference_forward(x_nchw, params, eps=1e-5):
    """Pure-JAX reference (lax.conv) for verification."""
    x = jnp.transpose(x_nchw, (0, 2, 3, 1))
    for (gamma, beta, w, b) in params:
        mean = jnp.mean(x, axis=(0, 1, 2))
        var = jnp.mean((x - mean) ** 2, axis=(0, 1, 2))
        a = jnp.maximum((x - mean) / jnp.sqrt(var + eps) * gamma + beta, 0.0)
        y = jax.lax.conv_general_dilated(
            a, w, window_strides=(1, 1), padding=((1, 1), (1, 1)),
            dimension_numbers=("NHWC", "HWIO", "NHWC")) + b
        x = jnp.concatenate([x, y], axis=-1)
    return jnp.transpose(x, (0, 3, 1, 2))


if __name__ == "__main__":
    # DenseBlock(num_convs=2, input_channels=4, num_channels=8)
    num_convs, input_channels, num_channels = 2, 4, 8
    N, H, W = 2, 16, 16

    key = jax.random.PRNGKey(0)
    key, kx = jax.random.split(key)
    x = jax.random.normal(kx, (N, input_channels, H, W), jnp.float32)  # NCHW

    params = make_params(key, num_convs, input_channels, num_channels)

    out = jax.block_until_ready(dense_block_forward(x, params))

    # Output channels = input_channels + num_convs * num_channels
    assert out.shape == (N, input_channels + num_convs * num_channels, H, W)

    ref = jax.block_until_ready(_reference_forward(x, params))
    np.testing.assert_allclose(np.asarray(out), np.asarray(ref),
                               rtol=1e-4, atol=1e-4)

    print("KERNEL_OK")
</pallas_src>

<mosaic_0001>
module attributes {stable_mosaic.version = 11 : i64} {
  func.func @kernel(%arg0: memref<8x512xf32, #tpu.memory_space<vmem>>, %arg1: memref<9x512xf32, #tpu.memory_space<vmem>>, %arg2: memref<8x1xf32, #tpu.memory_space<vmem>>, %arg3: memref<8x1xf32, #tpu.memory_space<vmem>>, %arg4: memref<8x72xf32, #tpu.memory_space<vmem>>, %arg5: memref<8x1xf32, #tpu.memory_space<vmem>>, %arg6: memref<16x1xf32, #tpu.memory_space<vmem>>, %arg7: memref<16x1xf32, #tpu.memory_space<vmem>>, %arg8: memref<8x144xf32, #tpu.memory_space<vmem>>, %arg9: memref<8x1xf32, #tpu.memory_space<vmem>>, %arg10: memref<24x512xf32, #tpu.memory_space<vmem>>, %arg11: memref<144x512xf32, #tpu.memory_space<vmem>>) attributes {dimension_semantics = [], scalar_prefetch = 0 : i64, scratch_operands = 1 : i64, tpu.core_type = #tpu.core_type<tc>} {
    %c0 = arith.constant 0 : index
    %c0_0 = arith.constant 0 : index
    %0 = vector.load %arg0[%c0, %c0_0] : memref<8x512xf32, #tpu.memory_space<vmem>>, vector<8x512xf32>
    %c0_1 = arith.constant 0 : index
    %c0_2 = arith.constant 0 : index
    %1 = vector.load %arg10[%c0_1, %c0_2] : memref<24x512xf32, #tpu.memory_space<vmem>>, vector<8x512xf32>
    tpu.vector_store %arg10[%c0_1, %c0_2], %0 {strides = array<i32>} : memref<24x512xf32, #tpu.memory_space<vmem>>, vector<8x512xf32>,
    %c0_3 = arith.constant 0 : index
    %c0_4 = arith.constant 0 : index
    %2 = vector.load %arg10[%c0_3, %c0_4] : memref<24x512xf32, #tpu.memory_space<vmem>>, vector<8x512xf32>
    %cst = arith.constant dense<0.000000e+00> : vector<8xf32>
    %3 = vector.multi_reduction <add>, %2, %cst [1] : vector<8x512xf32> to vector<8xf32>
    %4 = vector.shape_cast %3 : vector<8xf32> to vector<8x1xf32>
    %cst_5 = arith.constant 0.001953125 : f32
    %5 = vector.broadcast %cst_5 : f32 to vector<8x1xf32>
    %6 = arith.mulf %4, %5 : vector<8x1xf32>
    %7 = arith.mulf %2, %2 : vector<8x512xf32>
    %cst_6 = arith.constant dense<0.000000e+00> : vector<8xf32>
    %8 = vector.multi_reduction <add>, %7, %cst_6 [1] : vector<8x512xf32> to vector<8xf32>
    %9 = vector.shape_cast %8 : vector<8xf32> to vector<8x1xf32>
    %cst_7 = arith.constant 0.001953125 : f32
    %10 = vector.broadcast %cst_7 : f32 to vector<8x1xf32>
    %11 = arith.mulf %9, %10 : vector<8x1xf32>
    %12 = arith.mulf %6, %6 : vector<8x1xf32>
    %13 = arith.subf %11, %12 : vector<8x1xf32>
    %c0_8 = arith.constant 0 : index
    %c0_9 = arith.constant 0 : index
    %14 = vector.load %arg2[%c0_8, %c0_9] : memref<8x1xf32, #tpu.memory_space<vmem>>, vector<8x1xf32>
    %cst_10 = arith.constant 9.99999974E-6 : f32
    %15 = vector.broadcast %cst_10 : f32 to vector<8x1xf32>
    %16 = arith.addf %13, %15 : vector<8x1xf32>
    %17 = math.rsqrt %16 : vector<8x1xf32>
    %18 = arith.mulf %14, %17 : vector<8x1xf32>
    %c0_11 = arith.constant 0 : index
    %c0_12 = arith.constant 0 : index
    %19 = vector.load %arg3[%c0_11, %c0_12] : memref<8x1xf32, #tpu.memory_space<vmem>>, vector<8x1xf32>
    %20 = arith.mulf %6, %18 : vector<8x1xf32>
    %21 = arith.subf %19, %20 : vector<8x1xf32>
    %22 = vector.broadcast %18 : vector<8x1xf32> to vector<8x512xf32>
    %23 = arith.mulf %2, %22 : vector<8x512xf32>
    %24 = vector.broadcast %21 : vector<8x1xf32> to vector<8x512xf32>
    %25 = arith.addf %23, %24 : vector<8x512xf32>
    %cst_13 = arith.constant 0.000000e+00 : f32
    %26 = vector.broadcast %cst_13 : f32 to vector<8x512xf32>
    %27 = arith.maximumf %25, %26 : vector<8x512xf32>
    %c17_i32 = arith.constant 17 : i32
    %28 = tpu.dynamic_rotate %27 by %c17_i32 dim 1 : vector<8x512xf32>, i32 -> vector<8x512xf32>
    %c0_14 = arith.constant 0 : index
    %c0_15 = arith.constant 0 : index
    %29 = vector.load %arg1[%c0_14, %c0_15] : memref<9x512xf32, #tpu.memory_space<vmem>>, vector<1x512xf32>
    %30 = vector.broadcast %29 : vector<1x512xf32> to vector<8x512xf32>
    %31 = arith.mulf %28, %30 : vector<8x512xf32>
    %c0_16 = arith.constant 0 : index
    %c0_17 = arith.constant 0 : index
    %32 = vector.load %arg11[%c0_16, %c0_17] : memref<144x512xf32, #tpu.memory_space<vmem>>, vector<8x512xf32>
    tpu.vector_store %arg11[%c0_16, %c0_17], %31 {strides = array<i32>} : memref<144x512xf32, #tpu.memory_space<vmem>>, vector<8x512xf32>,
    %c16_i32 = arith.constant 16 : i32
    %33 = tpu.dynamic_rotate %27 by %c16_i32 dim 1 : vector<8x512xf32>, i32 -> vector<8x512xf32>
    %c1 = arith.constant 1 : index
    %c0_18 = arith.constant 0 : index
    %34 = vector.load %arg1[%c1, %c0_18] : memref<9x512xf32, #tpu.memory_space<vmem>>, vector<1x512xf32>
    %35 = vector.broadcast %34 : vector<1x512xf32> to vector<8x512xf32>
    %36 = arith.mulf %33, %35 : vector<8x512xf32>
    %c8 = arith.constant 8 : index
    %c0_19 = arith.constant 0 : index
    %37 = vector.load %arg11[%c8, %c0_19] : memref<144x512xf32, #tpu.memory_space<vmem>>, vector<8x512xf32>
    tpu.vector_store %arg11[%c8, %c0_19], %36 {strides = array<i32>} : memref<144x512xf32, #tpu.memory_space<vmem>>, vector<8x512xf32>,
    %c15_i32 = arith.constant 15 : i32
    %38 = tpu.dynamic_rotate %27 by %c15_i32 dim 1 : vector<8x512xf32>, i32 -> vector<8x512xf32>
    %c2 = arith.constant 2 : index
    %c0_20 = arith.constant 0 : index
    %39 = vector.load %arg1[%c2, %c0_20] : memref<9x512xf32, #tpu.memory_space<vmem>>, vector<1x512xf32>
    %40 = vector.broadcast %39 : vector<1x512xf32> to vector<8x512xf32>
    %41 = arith.mulf %38, %40 : vector<8x512xf32>
    %c16 = arith.constant 16 : index
    %c0_21 = arith.constant 0 : index
    %42 = vector.load %arg11[%c16, %c0_21] : memref<144x512xf32, #tpu.memory_space<vmem>>, vector<8x512xf32>
    tpu.vector_store %arg11[%c16, %c0_21], %41 {strides = array<i32>} : memref<144x512xf32, #tpu.memory_space<vmem>>, vector<8x512xf32>,
    %c1_i32 = arith.constant 1 : i32
    %43 = tpu.dynamic_rotate %27 by %c1_i32 dim 1 : vector<8x512xf32>, i32 -> vector<8x512xf32>
    %c3 = arith.constant 3 : index
    %c0_22 = arith.constant 0 : index
    %44 = vector.load %arg1[%c3, %c0_22] : memref<9x512xf32, #tpu.memory_space<vmem>>, vector<1x512xf32>
    %45 = vector.broadcast %44 : vector<1x512xf32> to vector<8x512xf32>
    %46 = arith.mulf %43, %45 : vector<8x512xf32>
    %c24 = arith.constant 24 : index
    %c0_23 = arith.constant 0 : index
    %47 = vector.load %arg11[%c24, %c0_23] : memref<144x512xf32, #tpu.memory_space<vmem>>, vector<8x512xf32>
    tpu.vector_store %arg11[%c24, %c0_23], %46 {strides = array<i32>} : memref<144x512xf32, #tpu.memory_space<vmem>>, vector<8x512xf32>,
    %c32 = arith.constant 32 : index
    %c0_24 = arith.constant 0 : index
    %48 = vector.load %arg11[%c32, %c0_24] : memref<144x512xf32, #tpu.memory_space<vmem>>, vector<8x512xf32>
    tpu.vector_store %arg11[%c32, %c0_24], %27 {strides = array<i32>} : memref<144x512xf32, #tpu.memory_space<vmem>>, vector<8x512xf32>,
    %c511_i32 = arith.constant 511 : i32
    %49 = tpu.dynamic_rotate %27 by %c511_i32 dim 1 : vector<8x512xf32>, i32 -> vector<8x512xf32>
    %c5 = arith.constant 5 : index
    %c0_25 = arith.constant 0 : index
    %50 = vector.load %arg1[%c5, %c0_25] : memref<9x512xf32, #tpu.memory_space<vmem>>, vector<1x512xf32>
    %51 = vector.broadcast %50 : vector<1x512xf32> to vector<8x512xf32>
    %52 = arith.mulf %49, %51 : vector<8x512xf32>
    %c40 = arith.constant 40 : index
    %c0_26 = arith.constant 0 : index
    %53 = vector.load %arg11[%c40, %c0_26] : memref<144x512xf32, #tpu.memory_space<vmem>>, vector<8x512xf32>
    tpu.vector_store %arg11[%c40, %c0_26], %52 {strides = array<i32>} : memref<144x512xf32, #tpu.memory_space<vmem>>, vector<8x512xf32>,
    %c497_i32 = arith.constant 497 : i32
    %54 = tpu.dynamic_rotate %27 by %c497_i32 dim 1 : vector<8x512xf32>, i32 -> vector<8x512xf32>
    %c6 = arith.constant 6 : index
    %c0_27 = arith.constant 0 : index
    %55 = vector.load %arg1[%c6, %c0_27] : memref<9x512xf32, #tpu.memory_space<vmem>>, vector<1x512xf32>
    %56 = vector.broadcast %55 : vector<1x512xf32> to vector<8x512xf32>
    %57 = arith.mulf %54, %56 : vector<8x512xf32>
    %c48 = arith.constant 48 : index
    %c0_28 = arith.constant 0 : index
    %58 = vector.load %arg11[%c48, %c0_28] : memref<144x512xf32, #tpu.memory_space<vmem>>, vector<8x512xf32>
    tpu.vector_store %arg11[%c48, %c0_28], %57 {strides = array<i32>} : memref<144x512xf32, #tpu.memory_space<vmem>>, vector<8x512xf32>,
    %c496_i32 = arith.constant 496 : i32
    %59 = tpu.dynamic_rotate %27 by %c496_i32 dim 1 : vector<8x512xf32>, i32 -> vector<8x512xf32>
    %c7 = arith.constant 7 : index
    %c0_29 = arith.constant 0 : index
    %60 = vector.load %arg1[%c7, %c0_29] : memref<9x512xf32, #tpu.memory_space<vmem>>, vector<1x512xf32>
    %61 = vector.broadcast %60 : vector<1x512xf32> to vector<8x512xf32>
    %62 = arith.mulf %59, %61 : vector<8x512xf32>
    %c56 = arith.constant 56 : index
    %c0_30 = arith.constant 0 : index
    %63 = vector.load %arg11[%c56, %c0_30] : memref<144x512xf32, #tpu.memory_space<vmem>>, vector<8x512xf32>
    tpu.vector_store %arg11[%c56, %c0_30], %62 {strides = array<i32>} : memref<144x512xf32, #tpu.memory_space<vmem>>, vector<8x512xf32>,
    %c495_i32 = arith.constant 495 : i32
    %64 = tpu.dynamic_rotate %27 by %c495_i32 dim 1 : vector<8x512xf32>, i32 -> vector<8x512xf32>
    %c8_31 = arith.constant 8 : index
    %c0_32 = arith.constant 0 : index
    %65 = vector.load %arg1[%c8_31, %c0_32] : memref<9x512xf32, #tpu.memory_space<vmem>>, vector<1x512xf32>
    %66 = vector.broadcast %65 : vector<1x512xf32> to vector<8x512xf32>
    %67 = arith.mulf %64, %66 : vector<8x512xf32>
    %c64 = arith.constant 64 : index
    %c0_33 = arith.constant 0 : index
    %68 = vector.load %arg11[%c64, %c0_33] : memref<144x512xf32, #tpu.memory_space<vmem>>, vector<8x512xf32>
    tpu.vector_store %arg11[%c64, %c0_33], %67 {strides = array<i32>} : memref<144x512xf32, #tpu.memory_space<vmem>>, vector<8x512xf32>,
    %c0_34 = arith.constant 0 : index
    %c0_35 = arith.constant 0 : index
    %69 = vector.load %arg4[%c0_34, %c0_35] : memref<8x72xf32, #tpu.memory_space<vmem>>, vector<8x72xf32>
    %c0_36 = arith.constant 0 : index
    %c0_37 = arith.constant 0 : index
    %70 = vector.load %arg11[%c0_36, %c0_37] : memref<144x512xf32, #tpu.memory_space<vmem>>, vector<72x512xf32>
    %cst_38 = arith.constant dense<0.000000e+00> : vector<8x512xf32>
    %71 = tpu.matmul %69, %70, %cst_38 {dimension_numbers = #tpu.dot_dimension_numbers<[1], [0], [0], [1], [0, 0, 1, 1], [], []>} : vector<8x72xf32>, vector<72x512xf32>, vector<8x512xf32> -> vector<8x512xf32>
    %c0_39 = arith.constant 0 : index
    %c0_40 = arith.constant 0 : index
    %72 = vector.load %arg5[%c0_39, %c0_40] : memref<8x1xf32, #tpu.memory_space<vmem>>, vector<8x1xf32>
    %73 = vector.broadcast %72 : vector<8x1xf32> to vector<8x512xf32>
    %74 = arith.addf %71, %73 : vector<8x512xf32>
    %c8_41 = arith.constant 8 : index
    %c0_42 = arith.constant 0 : index
    %75 = vector.load %arg10[%c8_41, %c0_42] : memref<24x512xf32, #tpu.memory_space<vmem>>, vector<8x512xf32>
    tpu.vector_store %arg10[%c8_41, %c0_42], %74 {strides = array<i32>} : memref<24x512xf32, #tpu.memory_space<vmem>>, vector<8x512xf32>,
    %c0_43 = arith.constant 0 : index
    %c0_44 = arith.constant 0 : index
    %76 = vector.load %arg10[%c0_43, %c0_44] : memref<24x512xf32, #tpu.memory_space<vmem>>, vector<16x512xf32>
    %cst_45 = arith.constant dense<0.000000e+00> : vector<16xf32>
    %77 = vector.multi_reduction <add>, %76, %cst_45 [1] : vector<16x512xf32> to vector<16xf32>
    %78 = vector.shape_cast %77 : vector<16xf32> to vector<16x1xf32>
    %cst_46 = arith.constant 0.001953125 : f32
    %79 = vector.broadcast %cst_46 : f32 to vector<16x1xf32>
    %80 = arith.mulf %78, %79 : vector<16x1xf32>
    %81 = arith.mulf %76, %76 : vector<16x512xf32>
    %cst_47 = arith.constant dense<0.000000e+00> : vector<16xf32>
    %82 = vector.multi_reduction <add>, %81, %cst_47 [1] : vector<16x512xf32> to vector<16xf32>
    %83 = vector.shape_cast %82 : vector<16xf32> to vector<16x1xf32>
    %cst_48 = arith.constant 0.001953125 : f32
    %84 = vector.broadcast %cst_48 : f32 to vector<16x1xf32>
    %85 = arith.mulf %83, %84 : vector<16x1xf32>
    %86 = arith.mulf %80, %80 : vector<16x1xf32>
    %87 = arith.subf %85, %86 : vector<16x1xf32>
    %c0_49 = arith.constant 0 : index
    %c0_50 = arith.constant 0 : index
    %88 = vector.load %arg6[%c0_49, %c0_50] : memref<16x1xf32, #tpu.memory_space<vmem>>, vector<16x1xf32>
    %cst_51 = arith.constant 9.99999974E-6 : f32
    %89 = vector.broadcast %cst_51 : f32 to vector<16x1xf32>
    %90 = arith.addf %87, %89 : vector<16x1xf32>
    %91 = math.rsqrt %90 : vector<16x1xf32>
    %92 = arith.mulf %88, %91 : vector<16x1xf32>
    %c0_52 = arith.constant 0 : index
    %c0_53 = arith.constant 0 : index
    %93 = vector.load %arg7[%c0_52, %c0_53] : memref<16x1xf32, #tpu.memory_space<vmem>>, vector<16x1xf32>
    %94 = arith.mulf %80, %92 : vector<16x1xf32>
    %95 = arith.subf %93, %94 : vector<16x1xf32>
    %96 = vector.broadcast %92 : vector<16x1xf32> to vector<16x512xf32>
    %97 = arith.mulf %76, %96 : vector<16x512xf32>
    %98 = vector.broadcast %95 : vector<16x1xf32> to vector<16x512xf32>
    %99 = arith.addf %97, %98 : vector<16x512xf32>
    %cst_54 = arith.constant 0.000000e+00 : f32
    %100 = vector.broadcast %cst_54 : f32 to vector<16x512xf32>
    %101 = arith.maximumf %99, %100 : vector<16x512xf32>
    %c17_i32_55 = arith.constant 17 : i32
    %102 = tpu.dynamic_rotate %101 by %c17_i32_55 dim 1 : vector<16x512xf32>, i32 -> vector<16x512xf32>
    %c0_56 = arith.constant 0 : index
    %c0_57 = arith.constant 0 : index
    %103 = vector.load %arg1[%c0_56, %c0_57] : memref<9x512xf32, #tpu.memory_space<vmem>>, vector<1x512xf32>
    %104 = vector.broadcast %103 : vector<1x512xf32> to vector<16x512xf32>
    %105 = arith.mulf %102, %104 : vector<16x512xf32>
    %c0_58 = arith.constant 0 : index
    %c0_59 = arith.constant 0 : index
    %106 = vector.load %arg11[%c0_58, %c0_59] : memref<144x512xf32, #tpu.memory_space<vmem>>, vector<16x512xf32>
    tpu.vector_store %arg11[%c0_58, %c0_59], %105 {strides = array<i32>} : memref<144x512xf32, #tpu.memory_space<vmem>>, vector<16x512xf32>,
    %c16_i32_60 = arith.constant 16 : i32
    %107 = tpu.dynamic_rotate %101 by %c16_i32_60 dim 1 : vector<16x512xf32>, i32 -> vector<16x512xf32>
    %c1_61 = arith.constant 1 : index
    %c0_62 = arith.constant 0 : index
    %108 = vector.load %arg1[%c1_61, %c0_62] : memref<9x512xf32, #tpu.memory_space<vmem>>, vector<1x512xf32>
    %109 = vector.broadcast %108 : vector<1x512xf32> to vector<16x512xf32>
    %110 = arith.mulf %107, %109 : vector<16x512xf32>
    %c16_63 = arith.constant 16 : index
    %c0_64 = arith.constant 0 : index
    %111 = vector.load %arg11[%c16_63, %c0_64] : memref<144x512xf32, #tpu.memory_space<vmem>>, vector<16x512xf32>
    tpu.vector_store %arg11[%c16_63, %c0_64], %110 {strides = array<i32>} : memref<144x512xf32, #tpu.memory_space<vmem>>, vector<16x512xf32>,
    %c15_i32_65 = arith.constant 15 : i32
    %112 = tpu.dynamic_rotate %101 by %c15_i32_65 dim 1 : vector<16x512xf32>, i32 -> vector<16x512xf32>
    %c2_66 = arith.constant 2 : index
    %c0_67 = arith.constant 0 : index
    %113 = vector.load %arg1[%c2_66, %c0_67] : memref<9x512xf32, #tpu.memory_space<vmem>>, vector<1x512xf32>
    %114 = vector.broadcast %113 : vector<1x512xf32> to vector<16x512xf32>
    %115 = arith.mulf %112, %114 : vector<16x512xf32>
    %c32_68 = arith.constant 32 : index
    %c0_69 = arith.constant 0 : index
    %116 = vector.load %arg11[%c32_68, %c0_69] : memref<144x512xf32, #tpu.memory_space<vmem>>, vector<16x512xf32>
    tpu.vector_store %arg11[%c32_68, %c0_69], %115 {strides = array<i32>} : memref<144x512xf32, #tpu.memory_space<vmem>>, vector<16x512xf32>,
    %c1_i32_70 = arith.constant 1 : i32
    %117 = tpu.dynamic_rotate %101 by %c1_i32_70 dim 1 : vector<16x512xf32>, i32 -> vector<16x512xf32>
    %c3_71 = arith.constant 3 : index
    %c0_72 = arith.constant 0 : index
    %118 = vector.load %arg1[%c3_71, %c0_72] : memref<9x512xf32, #tpu.memory_space<vmem>>, vector<1x512xf32>
    %119 = vector.broadcast %118 : vector<1x512xf32> to vector<16x512xf32>
    %120 = arith.mulf %117, %119 : vector<16x512xf32>
    %c48_73 = arith.constant 48 : index
    %c0_74 = arith.constant 0 : index
    %121 = vector.load %arg11[%c48_73, %c0_74] : memref<144x512xf32, #tpu.memory_space<vmem>>, vector<16x512xf32>
    tpu.vector_store %arg11[%c48_73, %c0_74], %120 {strides = array<i32>} : memref<144x512xf32, #tpu.memory_space<vmem>>, vector<16x512xf32>,
    %c64_75 = arith.constant 64 : index
    %c0_76 = arith.constant 0 : index
    %122 = vector.load %arg11[%c64_75, %c0_76] : memref<144x512xf32, #tpu.memory_space<vmem>>, vector<16x512xf32>
    tpu.vector_store %arg11[%c64_75, %c0_76], %101 {strides = array<i32>} : memref<144x512xf32, #tpu.memory_space<vmem>>, vector<16x512xf32>,
    %c511_i32_77 = arith.constant 511 : i32
    %123 = tpu.dynamic_rotate %101 by %c511_i32_77 dim 1 : vector<16x512xf32>, i32 -> vector<16x512xf32>
    %c5_78 = arith.constant 5 : index
    %c0_79 = arith.constant 0 : index
    %124 = vector.load %arg1[%c5_78, %c0_79] : memref<9x512xf32, #tpu.memory_space<vmem>>, vector<1x512xf32>
    %125 = vector.broadcast %124 : vector<1x512xf32> to vector<16x512xf32>
    %126 = arith.mulf %123, %125 : vector<16x512xf32>
    %c80 = arith.constant 80 : index
    %c0_80 = arith.constant 0 : index
    %127 = vector.load %arg11[%c80, %c0_80] : memref<144x512xf32, #tpu.memory_space<vmem>>, vector<16x512xf32>
    tpu.vector_store %arg11[%c80, %c0_80], %126 {strides = array<i32>} : memref<144x512xf32, #tpu.memory_space<vmem>>, vector<16x512xf32>,
    %c497_i32_81 = arith.constant 497 : i32
    %128 = tpu.dynamic_rotate %101 by %c497_i32_81 dim 1 : vector<16x512xf32>, i32 -> vector<16x512xf32>
    %c6_82 = arith.constant 6 : index
    %c0_83 = arith.constant 0 : index
    %129 = vector.load %arg1[%c6_82, %c0_83] : memref<9x512xf32, #tpu.memory_space<vmem>>, vector<1x512xf32>
    %130 = vector.broadcast %129 : vector<1x512xf32> to vector<16x512xf32>
    %131 = arith.mulf %128, %130 : vector<16x512xf32>
    %c96 = arith.constant 96 : index
    %c0_84 = arith.constant 0 : index
    %132 = vector.load %arg11[%c96, %c0_84] : memref<144x512xf32, #tpu.memory_space<vmem>>, vector<16x512xf32>
    tpu.vector_store %arg11[%c96, %c0_84], %131 {strides = array<i32>} : memref<144x512xf32, #tpu.memory_space<vmem>>, vector<16x512xf32>,
    %c496_i32_85 = arith.constant 496 : i32
    %133 = tpu.dynamic_rotate %101 by %c496_i32_85 dim 1 : vector<16x512xf32>, i32 -> vector<16x512xf32>
    %c7_86 = arith.constant 7 : index
    %c0_87 = arith.constant 0 : index
    %134 = vector.load %arg1[%c7_86, %c0_87] : memref<9x512xf32, #tpu.memory_space<vmem>>, vector<1x512xf32>
    %135 = vector.broadcast %134 : vector<1x512xf32> to vector<16x512xf32>
    %136 = arith.mulf %133, %135 : vector<16x512xf32>
    %c112 = arith.constant 112 : index
    %c0_88 = arith.constant 0 : index
    %137 = vector.load %arg11[%c112, %c0_88] : memref<144x512xf32, #tpu.memory_space<vmem>>, vector<16x512xf32>
    tpu.vector_store %arg11[%c112, %c0_88], %136 {strides = array<i32>} : memref<144x512xf32, #tpu.memory_space<vmem>>, vector<16x512xf32>,
    %c495_i32_89 = arith.constant 495 : i32
    %138 = tpu.dynamic_rotate %101 by %c495_i32_89 dim 1 : vector<16x512xf32>, i32 -> vector<16x512xf32>
    %c8_90 = arith.constant 8 : index
    %c0_91 = arith.constant 0 : index
    %139 = vector.load %arg1[%c8_90, %c0_91] : memref<9x512xf32, #tpu.memory_space<vmem>>, vector<1x512xf32>
    %140 = vector.broadcast %139 : vector<1x512xf32> to vector<16x512xf32>
    %141 = arith.mulf %138, %140 : vector<16x512xf32>
    %c128 = arith.constant 128 : index
    %c0_92 = arith.constant 0 : index
    %142 = vector.load %arg11[%c128, %c0_92] : memref<144x512xf32, #tpu.memory_space<vmem>>, vector<16x512xf32>
    tpu.vector_store %arg11[%c128, %c0_92], %141 {strides = array<i32>} : memref<144x512xf32, #tpu.memory_space<vmem>>, vector<16x512xf32>,
    %c0_93 = arith.constant 0 : index
    %c0_94 = arith.constant 0 : index
    %143 = vector.load %arg8[%c0_93, %c0_94] : memref<8x144xf32, #tpu.memory_space<vmem>>, vector<8x144xf32>
    %c0_95 = arith.constant 0 : index
    %c0_96 = arith.constant 0 : index
    %144 = vector.load %arg11[%c0_95, %c0_96] : memref<144x512xf32, #tpu.memory_space<vmem>>, vector<144x512xf32>
    %cst_97 = arith.constant dense<0.000000e+00> : vector<8x512xf32>
    %145 = tpu.matmul %143, %144, %cst_97 {dimension_numbers = #tpu.dot_dimension_numbers<[1], [0], [0], [1], [0, 0, 1, 1], [], []>} : vector<8x144xf32>, vector<144x512xf32>, vector<8x512xf32> -> vector<8x512xf32>
    %c0_98 = arith.constant 0 : index
    %c0_99 = arith.constant 0 : index
    %146 = vector.load %arg9[%c0_98, %c0_99] : memref<8x1xf32, #tpu.memory_space<vmem>>, vector<8x1xf32>
    %147 = vector.broadcast %146 : vector<8x1xf32> to vector<8x512xf32>
    %148 = arith.addf %145, %147 : vector<8x512xf32>
    %c16_100 = arith.constant 16 : index
    %c0_101 = arith.constant 0 : index
    %149 = vector.load %arg10[%c16_100, %c0_101] : memref<24x512xf32, #tpu.memory_space<vmem>>, vector<8x512xf32>
    tpu.vector_store %arg10[%c16_100, %c0_101], %148 {strides = array<i32>} : memref<24x512xf32, #tpu.memory_space<vmem>>, vector<8x512xf32>,
    return
  }
}

</mosaic_0001>

<bundles_post_ra>
// kernel: tpu_custom_call.1
= control target key start
LH: loop header
LB: loop body
LE: loop exit
PB: predicated region body
PF: predicated region fallthrough
CT: control target
= control target key end

     0   :  { %15 = vsyncpa [#allocation4], 0  ;;  %s2282_s0 = inlined_call_operand.vmem [shape: f32[8,512], index: 0, kind: input, shape index: {}]   ;;  %s2283_s1 = inlined_call_operand.hbm [shape: f32[9,512], index: 1, kind: input, shape index: {}]   ;;  %s2284_s2 = inlined_call_operand.vmem [shape: f32[8,1], index: 2, kind: input, shape index: {}]   ;;  %s2285_s3 = inlined_call_operand.vmem [shape: f32[8,1], index: 3, kind: input, shape index: {}]   ;;  %s2286_s4 = inlined_call_operand.vmem [shape: f32[8,72], index: 4, kind: input, shape index: {}]   ;;  %s2287_s5 = inlined_call_operand.vmem [shape: f32[8,1], index: 5, kind: input, shape index: {}]   ;;  %s2288_s6 = inlined_call_operand.vmem [shape: f32[16,1], index: 6, kind: input, shape index: {}]   ;;  %s2289_s7 = inlined_call_operand.vmem [shape: f32[16,1], index: 7, kind: input, shape index: {}]   ;;  %s2290_s8 = inlined_call_operand.vmem [shape: f32[8,144], index: 8, kind: input, shape index: {}]   ;;  %s2291_s9 = inlined_call_operand.vmem [shape: f32[8,1], index: 9, kind: input, shape index: {}]   ;;  %s2292_s10 = inlined_call_operand.hbm [shape: f32[24,512], index: 10, kind: output, shape index: {}]  }
   0x1   :  { %16 = vsyncpa [#allocation5], 0  ;;  %s23_s15 = sshll.u32 %s2283_s1, 4  ;;  %s1389_s16 = smov [#allocation3]   ;;  %s24_s15 = int_to_ptr.hbm [resolvable:$true] %s23_s15 }
   0x2   :  { %s25_s17 = sshll.u32 %s1389_s16, 4  ;;  %s1390_s18 = smov 512   ;;  %s26_s17 = int_to_ptr.vmem [resolvable:$true] %s25_s17 }
   0x3   :  { %s1391_s19 = smov 32  }
   0x4   :  { %31 = dma.hbm_to_vmem [thread:$0]  %s24_s15, 1024, %s26_s17, [#allocation4], %s1390_s18, %s1390_s18, %s1391_s19  }
   0x5   :  { %1385 = dma.done.wait [#allocation4], 1024  }
   0x6   :  { %1386 = vsyncadd [#allocation4], 4294966272  ;;  %v1466_v0 = vld [vmem:[%s2282_s0] sm:$0xff]  ;;  %v1471_v1 = vld [vmem:[%s2282_s0 + $0x8] sm:$0xff]  ;;  %v1392_v14 = vmov 0   ;;  %s1395_s30 = smov 113   ;;  %v128_v48 = vlaneseq }
   0x7   :  { %v1476_v2 = vld [vmem:[%s2282_s0 + $0x10] sm:$0xff]  ;;  %56 = vst [vmem:[#allocation6] sm:$0xff] %v1466_v0  ;;  %v64_v3 = vadd.f32 %v1471_v1, %v1466_v0  ;;  %v70_v4 = vmul.f32 %v1466_v0, %v1466_v0  ;;  %v71_v5 = vmul.f32 %v1471_v1, %v1471_v1  ;;  %v1488_v6 = vld [vmem:[%s2282_s0 + $0x18] sm:$0xff]  ;;  %1328 = vset.pattern.permute.xlu1 %v1392_v14  ;;  %v82_v27 = vld [vmem:[%s2284_s2] sm:$0xff]  ;;  %s1393_s2 = smov 112   ;;  %s1396_s11 = smov 127  }
   0x8   :  { %57 = vst [vmem:[#allocation6 + $0x8] sm:$0xff] %v1471_v1  ;;  %v72_v8 = vmul.f32 %v1476_v2, %v1476_v2  ;;  %v73_v11 = vmul.f32 %v1488_v6, %v1488_v6  ;;  %1329 = vset.pattern.permute.xlu2 %v1392_v14  ;;  %1330 = vset.pattern.permute.xlu0 %v1392_v14  ;;  %v95_v32 = vld [vmem:[%s2285_s3] sm:$0xff]  ;;  %s1394_s3 = smov 111   ;;  %s1397_s12 = smov 1   ;;  %v1587_v50 = vand.u32 127, %v128_v48  ;;  %vm424_vm11 = vcmask 588800  }
   0x9   :  { %58 = vst [vmem:[#allocation6 + $0x10] sm:$0xff] %v1476_v2  ;;  %v65_v7 = vadd.f32 %v64_v3, %v1476_v2  ;;  %v74_v9 = vadd.f32 %v71_v5, %v70_v4  ;;  %s1398_s13 = smov 15   ;;  %s1399_s14 = smov 16   ;;  %v363_v51 = vld [vmem:[#allocation3 + $0x20] ss:$8 sm:$0xf] }
   0xa   :  { %59 = vst [vmem:[#allocation6 + $0x18] sm:$0xff] %v1488_v6  ;;  %s1400_s15 = smov 17   ;;  %vm357_vm3 = vcmp.lt.s32.totalorder %v1587_v50, 111  ;;  %v367_v52 = vperm.slane %v363_v51, 2  ;;  %v368_v56 = vperm.slane %v363_v51, 3  ;;  %vm325_vm4 = vcmp.lt.s32.totalorder %v1587_v50, 112 }
   0xb   :  { %v1497_v10 = vadd.f32 %v65_v7, %v1488_v6  ;;  %v75_v12 = vadd.f32 %v74_v9, %v72_v8  ;;  %v331_v60 = vld [vmem:[#allocation3 + $0x7] ss:$8 sm:$0xf]  ;;  %v299_v7 = vld [vmem:[#allocation3 + $0x6] ss:$8 sm:$0xf] }
   0xc   :  { %v335_v61 = vperm.slane %v331_v60, 2  ;;  %vm293_vm5 = vcmp.lt.s32.totalorder %v1587_v50, 113  ;;  %v303_v8 = vperm.slane %v299_v7, 2  ;;  %v365_v9 = vperm.slane %v363_v51, 0 }
   0xd   :  { %67 = vadd.xlane.f32.xlu0 %v1497_v10  ;;  %v1502_v13 = vadd.f32 %v75_v12, %v73_v11  ;;  %v366_v11 = vperm.slane %v363_v51, 1  ;;  %vm261_vm6 = vcmp.lt.s32.totalorder %v1587_v50, 127  ;;  %vm225_vm7 = vcmp.lt.s32.totalorder %v1587_v50, 1 }
   0xe   :  { %vm193_vm8 = vcmp.lt.s32.totalorder %v1587_v50, 15  ;;  %vm161_vm9 = vcmp.lt.s32.totalorder %v1587_v50, 16  ;;  %vm130_vm10 = vcmp.lt.s32.totalorder %v1587_v50, 17 }
  0x15   :  { %77 = vadd.xlane.f32.xlu0 %v1502_v13 }
  0x80   :  { %v68_v15 = vpop.xlane.xlu0 %67 }
  0x81   :  { %v69_v16 = vmul.f32 0.001953125, %v68_v15 }
  0x83   :  { %v80_v18 = vmul.f32 %v69_v16, %v69_v16 }
  0x88   :  { %v78_v17 = vpop.xlane.xlu0 %77 }
  0x89   :  { %v79_v19 = vmul.f32 0.001953125, %v78_v17 }
  0x8b   :  { %v81_v20 = vsub.f32 %v79_v19, %v80_v18 }
  0x8d   :  { %v83_v21 = vadd.f32 1e-05, %v81_v20 }
  0x8f   :  { %1331 = vrsqrt.f32 %v83_v21  ;;  %vm90_vm1 = vweird.f32 %v83_v21 }
  0x95   :  { %v1332_v22 = vpop.eup %1331 }
  0x96   :  { %v85_v23 = vmul.f32 %v1332_v22, %v83_v21  ;;  %vm91_vm0 = vweird.f32 %v1332_v22  ;;  %v333_v21 = vperm.slane %v331_v60, 0 }
  0x97   :  { %vm92_vm2 = vmor %vm90_vm1, %vm91_vm0 }
  0x98   :  { %v86_v24 = vmul.f32 %v1332_v22, %v85_v23  ;;  %v336_v23 = vperm.slane %v331_v60, 3 }
  0x9a   :  { %v87_v25 = vmul.f32 0.5, %v86_v24 }
  0x9c   :  { %v88_v26 = vsub.f32 1.5, %v87_v25 }
  0x9e   :  { %v89_v28 = vmul.f32 %v1332_v22, %v88_v26 }
  0xa0   :  { %v93_v29 = vsel %vm92_vm2, %v1332_v22, %v89_v28  ;;  %v334_v22 = vperm.slane %v331_v60, 1  ;;  %vm1120_vm2 = vcmask 130048  }
  0xa1   :  { %v94_v30 = vmul.f32 %v93_v29, %v82_v27  ;;  %v304_v29 = vperm.slane %v299_v7, 3 }
  0xa3   :  { %100 = vperm.xlu1 %1328, %v94_v30   ;;  %v96_v31 = vmul.f32 %v94_v30, %v69_v16 }
  0xa5   :  { %v97_v33 = vsub.f32 %v95_v32, %v96_v31 }
  0xab   :  { %109 = vperm.xlu1 %1328, %v97_v33  }
 0x115   :  { %v101_v34 = vpop.permute.xlu1 %100 }
 0x116   :  { %v105_v35 = vmul.f32 %v101_v34, %v1476_v2  ;;  %v106_v36 = vmul.f32 %v101_v34, %v1488_v6  ;;  %v103_v42 = vmul.f32 %v101_v34, %v1466_v0  ;;  %v104_v43 = vmul.f32 %v101_v34, %v1471_v1  ;;  %v267_v34 = vld [vmem:[#allocation3 + $0x5] ss:$8 sm:$0xf] }
 0x11d   :  { %v110_v37 = vpop.permute.xlu1 %109 }
 0x11e   :  { %v114_v38 = vadd.f32 %v110_v37, %v105_v35  ;;  %v115_v39 = vadd.f32 %v110_v37, %v106_v36  ;;  %v112_v44 = vadd.f32 %v110_v37, %v103_v42  ;;  %v113_v45 = vadd.f32 %v110_v37, %v104_v43 }
 0x11f   :  { %v271_v36 = vperm.slane %v267_v34, 2  ;;  %v301_v37 = vperm.slane %v299_v7, 0 }
 0x120   :  { %v1513_v40 = vmax.f32 %v114_v38, 0.0  ;;  %v1515_v41 = vmax.f32 %v115_v39, 0.0  ;;  %v1531_v46 = vmax.f32 %v112_v44, 0.0  ;;  %v1533_v47 = vmax.f32 %v113_v45, 0.0 }
 0x121   :  { %v302_v38 = vperm.slane %v299_v7, 1 }
 0x122   :  { %323 = vrot.lane.b32.xlu1 %v1515_v41, %s1393_s2  ;;  %321 = vrot.lane.b32.xlu0 %v1513_v40, %s1393_s2 }
 0x123   :  { %353 = vrot.lane.b32.xlu2 %v1513_v40, %s1394_s3 }
 0x12a   :  { %289 = vrot.lane.b32.xlu1 %v1513_v40, %s1395_s30  ;;  %257 = vrot.lane.b32.xlu0 %v1513_v40, %s1396_s11 }
 0x12b   :  { %355 = vrot.lane.b32.xlu2 %v1515_v41, %s1394_s3 }
 0x132   :  { %319 = vrot.lane.b32.xlu0 %v1533_v47, %s1393_s2  ;;  %317 = vrot.lane.b32.xlu1 %v1531_v46, %s1393_s2 }
 0x133   :  { %349 = vrot.lane.b32.xlu2 %v1531_v46, %s1394_s3 }
 0x13a   :  { %219 = vrot.lane.b32.xlu0 %v1533_v47, %s1397_s12  ;;  %259 = vrot.lane.b32.xlu1 %v1515_v41, %s1396_s11 }
 0x13b   :  { %291 = vrot.lane.b32.xlu2 %v1515_v41, %s1395_s30 }
 0x142   :  { %187 = vrot.lane.b32.xlu0 %v1533_v47, %s1398_s13  ;;  %253 = vrot.lane.b32.xlu1 %v1531_v46, %s1396_s11 }
 0x143   :  { %351 = vrot.lane.b32.xlu2 %v1533_v47, %s1394_s3 }
 0x14a   :  { %155 = vrot.lane.b32.xlu0 %v1533_v47, %s1399_s14  ;;  %221 = vrot.lane.b32.xlu1 %v1513_v40, %s1397_s12 }
 0x14b   :  { %285 = vrot.lane.b32.xlu2 %v1531_v46, %s1395_s30 }
 0x152   :  { %217 = vrot.lane.b32.xlu0 %v1531_v46, %s1397_s12  ;;  %189 = vrot.lane.b32.xlu1 %v1513_v40, %s1398_s13 }
 0x153   :  { %287 = vrot.lane.b32.xlu2 %v1533_v47, %s1395_s30 }
 0x15a   :  { %159 = vrot.lane.b32.xlu0 %v1515_v41, %s1399_s14  ;;  %157 = vrot.lane.b32.xlu1 %v1513_v40, %s1399_s14 }
 0x15b   :  { %255 = vrot.lane.b32.xlu2 %v1533_v47, %s1396_s11 }
 0x162   :  { %153 = vrot.lane.b32.xlu0 %v1531_v46, %s1399_s14  ;;  %122 = vrot.lane.b32.xlu1 %v1533_v47, %s1400_s15 }
 0x163   :  { %223 = vrot.lane.b32.xlu2 %v1515_v41, %s1397_s12 }
 0x16a   :  { %185 = vrot.lane.b32.xlu1 %v1531_v46, %s1398_s13 }
 0x16b   :  { %191 = vrot.lane.b32.xlu2 %v1515_v41, %s1398_s13 }
 0x172   :  { %120 = vrot.lane.b32.xlu1 %v1531_v46, %s1400_s15 }
 0x173   :  { %124 = vrot.lane.b32.xlu2 %v1513_v40, %s1400_s15 }
 0x17b   :  { %126 = vrot.lane.b32.xlu2 %v1515_v41, %s1400_s15 }
 0x17d   :  { %v354_v49 = vpop.permute.xlu2 %353 }
 0x185   :  { %v356_v53 = vpop.permute.xlu2 %355 }
 0x186   :  { %v358_v54 = vsel %vm357_vm3, %v354_v49, %v356_v53 }
 0x187   :  { %v375_v55 = vmul.f32 %v367_v52, %v358_v54  ;;  %v269_v54 = vperm.slane %v267_v34, 0 }
 0x189   :  { %475 = vmatpush.msra.mxu2 %v375_v55  ;;  %v270_v55 = vperm.slane %v267_v34, 1 }
 0x18c   :  { %543 = vadd.xlane.f32.xlu0 %v1502_v13 }
 0x18d   :  { %v350_v57 = vpop.permute.xlu2 %349 }
 0x18e   :  { %v361_v58 = vsel %vm357_vm3, %v356_v53, %v350_v57  ;;  %v272_v53 = vperm.slane %v267_v34, 3 }
 0x18f   :  { %v376_v59 = vmul.f32 %v368_v56, %v361_v58 }
 0x191   :  { %495 = vmatpush.msra.mxu3 %v376_v59 }
 0x194   :  { %v324_v62 = vpop.permute.xlu1 %323  ;;  %v322_v63 = vpop.permute.xlu0 %321 }
 0x195   :  { %v326_v3 = vsel %vm325_vm4, %v322_v63, %v324_v62  ;;  %v292_v4 = vpop.permute.xlu2 %291 }
 0x196   :  { %v343_v5 = vmul.f32 %v335_v61, %v326_v3 }
 0x198   :  { %476 = vmatpush.msra.mxu2 %v343_v5 }
 0x19c   :  { %v290_v12 = vpop.permute.xlu1 %289  ;;  %v258_v13 = vpop.permute.xlu0 %257  ;;  %523 = vadd.xlane.f32.xlu1 %v1497_v10 }
 0x19d   :  { %v294_v14 = vsel %vm293_vm5, %v290_v12, %v292_v4  ;;  %v352_v15 = vpop.permute.xlu2 %351 }
 0x19e   :  { %v360_v16 = vsel %vm357_vm3, %v350_v57, %v352_v15  ;;  %v359_v17 = vsel %vm357_vm3, %v352_v15, %v354_v49  ;;  %v311_v18 = vmul.f32 %v303_v8, %v294_v14 }
 0x19f   :  { %v373_v19 = vmul.f32 %v365_v9, %v360_v16  ;;  %v374_v20 = vmul.f32 %v366_v11, %v359_v17 }
 0x1a0   :  { %477 = vmatpush.msra.mxu2 %v311_v18 }
 0x1a1   :  { %435 = vmatpush.msra.mxu0 %v373_v19  ;;  %455 = vmatpush.msra.mxu1 %v374_v20 }
 0x1a4   :  { %v320_v10 = vpop.permute.xlu0 %319  ;;  %v318_v24 = vpop.permute.xlu1 %317 }
 0x1a5   :  { %v327_v25 = vsel %vm325_vm4, %v320_v10, %v322_v63  ;;  %v328_v26 = vsel %vm325_vm4, %v318_v24, %v320_v10  ;;  %v329_v27 = vsel %vm325_vm4, %v324_v62, %v318_v24  ;;  %v286_v28 = vpop.permute.xlu2 %285 }
 0x1a6   :  { %v297_v30 = vsel %vm293_vm5, %v292_v4, %v286_v28  ;;  %v341_v31 = vmul.f32 %v333_v21, %v328_v26  ;;  %v342_v32 = vmul.f32 %v334_v22, %v327_v25  ;;  %v344_v33 = vmul.f32 %v336_v23, %v329_v27  ;;  %v167_v27 = vld [vmem:[#allocation3 + $0x1] ss:$8 sm:$0xf] }
 0x1a7   :  { %v312_v35 = vmul.f32 %v304_v29, %v297_v30  ;;  %v172_v29 = vperm.slane %v167_v27, 3 }
 0x1a8   :  { %436 = vmatpush.msra.mxu0 %v341_v31  ;;  %456 = vmatpush.msra.mxu1 %v342_v32 }
 0x1a9   :  { %496 = vmatpush.msra.mxu3 %v344_v33 }
 0x1ab   :  { %497 = vmatpush.msra.mxu3 %v312_v35 }
 0x1ac   :  { %v220_v39 = vpop.permute.xlu0 %219  ;;  %v260_v42 = vpop.permute.xlu1 %259 }
 0x1ad   :  { %v262_v43 = vsel %vm261_vm6, %v258_v13, %v260_v42  ;;  %v288_v44 = vpop.permute.xlu2 %287 }
 0x1ae   :  { %v295_v45 = vsel %vm293_vm5, %v288_v44, %v290_v12  ;;  %v296_v48 = vsel %vm293_vm5, %v286_v28, %v288_v44  ;;  %v279_v49 = vmul.f32 %v271_v36, %v262_v43  ;;  %v171_v28 = vperm.slane %v167_v27, 2 }
 0x1af   :  { %v309_v51 = vmul.f32 %v301_v37, %v296_v48  ;;  %v310_v52 = vmul.f32 %v302_v38, %v295_v45  ;;  %v135_v37 = vld [vmem:[#allocation3] ss:$8 sm:$0xf] }
 0x1b0   :  { %478 = vmatpush.msra.mxu2 %v279_v49  ;;  %v139_v38 = vperm.slane %v135_v37, 2 }
 0x1b1   :  { %437 = vmatpush.msra.mxu0 %v309_v51  ;;  %457 = vmatpush.msra.mxu1 %v310_v52 }
 0x1b2   :  { %479 = vmatpush.msra.mxu2 %v1513_v40  ;;  %v231_v40 = vld [vmem:[#allocation3 + $0x3] ss:$8 sm:$0xf] }
 0x1b3   :  { %v235_v4 = vperm.slane %v231_v40, 2  ;;  %v236_v5 = vperm.slane %v231_v40, 3  ;;  %v234_v15 = vperm.slane %v231_v40, 1 }
 0x1b4   :  { %v1622_v56 = vpop.permute.xlu0 %187  ;;  %v254_v57 = vpop.permute.xlu1 %253 }
 0x1b5   :  { %v265_v58 = vsel %vm261_vm6, %v260_v42, %v254_v57  ;;  %v256_v59 = vpop.permute.xlu2 %255 }
 0x1b6   :  { %v263_v60 = vsel %vm261_vm6, %v256_v59, %v258_v13  ;;  %v264_v61 = vsel %vm261_vm6, %v254_v57, %v256_v59  ;;  %v280_v62 = vmul.f32 %v272_v53, %v265_v58  ;;  %v170_v57 = vperm.slane %v167_v27, 1 }
 0x1b7   :  { %v277_v63 = vmul.f32 %v269_v54, %v264_v61  ;;  %v278_v3 = vmul.f32 %v270_v55, %v263_v60  ;;  %v169_v55 = vperm.slane %v167_v27, 0 }
 0x1b8   :  { %498 = vmatpush.msra.mxu3 %v280_v62 }
 0x1b9   :  { %438 = vmatpush.msra.mxu0 %v277_v63  ;;  %458 = vmatpush.msra.mxu1 %v278_v3 }
 0x1ba   :  { %499 = vmatpush.msra.mxu3 %v1515_v41  ;;  %v199_v41 = vld [vmem:[#allocation3 + $0x2] ss:$8 sm:$0xf] }
 0x1bb   :  { %439 = vmatpush.msra.mxu0 %v1531_v46  ;;  %459 = vmatpush.msra.mxu1 %v1533_v47  ;;  %v233_v46 = vperm.slane %v231_v40, 0  ;;  %v203_v47 = vperm.slane %v199_v41, 2  ;;  %v204_v16 = vperm.slane %v199_v41, 3  ;;  %v201_v52 = vperm.slane %v199_v41, 0 }
 0x1bc   :  { %v156_v7 = vpop.permute.xlu0 %155  ;;  %v222_v8 = vpop.permute.xlu1 %221  ;;  %v202_v53 = vperm.slane %v199_v41, 1 }
 0x1bd   :  { %v227_v9 = vsel %vm225_vm7, %v220_v39, %v222_v8  ;;  %v224_v11 = vpop.permute.xlu2 %223 }
 0x1be   :  { %v226_v12 = vsel %vm225_vm7, %v222_v8, %v224_v11  ;;  %v243_v13 = vmul.f32 %v235_v4, %v227_v9  ;;  %v137_v4 = vperm.slane %v135_v37, 0 }
 0x1bf   :  { %v244_v14 = vmul.f32 %v236_v5, %v226_v12  ;;  %v138_v5 = vperm.slane %v135_v37, 1  ;;  %v381_v12 = vld [vmem:[%s2286_s4] sm:$0xff] }
 0x1c0   :  { %480 = vmatpush.msra.mxu2 %v243_v13  ;;  %v418_v13 = vld [vmem:[%s2287_s5] sm:$0xff] }
 0x1c1   :  { %500 = vmatpush.msra.mxu3 %v244_v14  ;;  %421 = vperm.xlu2 %1329, %v418_v13  }
 0x1c4   :  { %v218_v17 = vpop.permute.xlu0 %217  ;;  %v190_v18 = vpop.permute.xlu1 %189 }
 0x1c5   :  { %v228_v19 = vsel %vm225_vm7, %v218_v17, %v220_v39  ;;  %v229_v20 = vsel %vm225_vm7, %v224_v11, %v218_v17  ;;  %v195_v21 = vsel %vm193_vm8, %v1622_v56, %v190_v18  ;;  %v192_v22 = vpop.permute.xlu2 %191  ;;  %v140_v39 = vperm.slane %v135_v37, 3 }
 0x1c6   :  { %v194_v23 = vsel %vm193_vm8, %v190_v18, %v192_v22  ;;  %v241_v10 = vmul.f32 %v233_v46, %v229_v20  ;;  %v242_v24 = vmul.f32 %v234_v15, %v228_v19  ;;  %v211_v25 = vmul.f32 %v203_v47, %v195_v21 }
 0x1c7   :  { %v212_v26 = vmul.f32 %v204_v16, %v194_v23  ;;  %v556_v23 = vld [vmem:[%s2288_s6] sm:$0xff] }
 0x1c8   :  { %440 = vmatpush.msra.mxu0 %v241_v10  ;;  %460 = vmatpush.msra.mxu1 %v242_v24 }
 0x1c9   :  { %481 = vmatpush.msra.mxu2 %v211_v25  ;;  %501 = vmatpush.msra.mxu3 %v212_v26  ;;  %v582_v26 = vld [vmem:[%s2289_s7] sm:$0xff] }
 0x1cc   :  { %v160_v30 = vpop.permute.xlu0 %159  ;;  %v158_v31 = vpop.permute.xlu1 %157 }
 0x1cd   :  { %v162_v32 = vsel %vm161_vm9, %v158_v31, %v160_v30  ;;  %v163_v33 = vsel %vm161_vm9, %v156_v7, %v158_v31  ;;  %v125_v34 = vpop.permute.xlu2 %124 }
 0x1ce   :  { %v179_v35 = vmul.f32 %v171_v28, %v163_v33  ;;  %v180_v36 = vmul.f32 %v172_v29, %v162_v32 }
 0x1d0   :  { %482 = vmatpush.msra.mxu2 %v179_v35  ;;  %502 = vmatpush.msra.mxu3 %v180_v36 }
 0x1d4   :  { %v123_v42 = vpop.permute.xlu1 %122  ;;  %v154_v51 = vpop.permute.xlu0 %153 }
 0x1d5   :  { %v132_v43 = vsel %vm130_vm10, %v123_v42, %v125_v34  ;;  %v127_v44 = vpop.permute.xlu2 %126  ;;  %v164_v58 = vsel %vm161_vm9, %v154_v51, %v156_v7  ;;  %v165_v59 = vsel %vm161_vm9, %v160_v30, %v154_v51 }
 0x1d6   :  { %v131_v45 = vsel %vm130_vm10, %v125_v34, %v127_v44  ;;  %v147_v48 = vmul.f32 %v139_v38, %v132_v43  ;;  %v177_v3 = vmul.f32 %v169_v55, %v165_v59  ;;  %v178_v40 = vmul.f32 %v170_v57, %v164_v58 }
 0x1d7   :  { %v148_v49 = vmul.f32 %v140_v39, %v131_v45 }
 0x1d8   :  { %483 = vmatpush.msra.mxu2 %v147_v48 }
 0x1d9   :  { %503 = vmatpush.msra.mxu3 %v148_v49  ;;  %1309 = vmatmul.msk.f32.vlgmr.msra.gmra.mxu2 %vm424_vm11, %v381_v12 }
 0x1da   :  { %1310 = vmatmul.msk.f32.vlgmr.msra.gmra.mxu3 %vm424_vm11, %v381_v12 }
 0x1dc   :  { %v186_v54 = vpop.permute.xlu1 %185 }
 0x1dd   :  { %v196_v60 = vsel %vm193_vm8, %v186_v54, %v1622_v56  ;;  %v197_v61 = vsel %vm193_vm8, %v192_v22, %v186_v54 }
 0x1de   :  { %v209_v62 = vmul.f32 %v201_v52, %v197_v61  ;;  %v210_v63 = vmul.f32 %v202_v53, %v196_v60 }
 0x1e0   :  { %441 = vmatpush.msra.mxu0 %v209_v62  ;;  %461 = vmatpush.msra.mxu1 %v210_v63 }
 0x1e2   :  { %442 = vmatpush.msra.mxu0 %v177_v3  ;;  %462 = vmatpush.msra.mxu1 %v178_v40 }
 0x1e4   :  { %v121_v7 = vpop.permute.xlu1 %120 }
 0x1e5   :  { %v133_v8 = vsel %vm130_vm10, %v121_v7, %v123_v42  ;;  %v134_v56 = vsel %vm130_vm10, %v127_v44, %v121_v7 }
 0x1e6   :  { %v145_v9 = vmul.f32 %v137_v4, %v134_v56  ;;  %v146_v11 = vmul.f32 %v138_v5, %v133_v8 }
 0x1e8   :  { %443 = vmatpush.msra.mxu0 %v145_v9  ;;  %463 = vmatpush.msra.mxu1 %v146_v11 }
 0x1e9   :  { %1307 = vmatmul.msk.f32.vlgmr.msra.gmra.mxu0 %vm424_vm11, %v381_v12  ;;  %1308 = vmatmul.msk.f32.vlgmr.msra.gmra.mxu1 %vm424_vm11, %v381_v12 }
 0x1ff   :  { %v544_v14 = vpop.xlane.xlu0 %543 }
 0x200   :  { %v550_v15 = vmul.f32 0.001953125, %v544_v14 }
 0x20f   :  { %v524_v41 = vpop.xlane.xlu1 %523 }
 0x210   :  { %v530_v46 = vmul.f32 0.001953125, %v524_v41 }
 0x212   :  { %v552_v47 = vmul.f32 %v530_v46, %v530_v46 }
 0x214   :  { %v554_v16 = vsub.f32 %v550_v15, %v552_v47 }
 0x216   :  { %v558_v17 = vadd.f32 1e-05, %v554_v16 }
 0x218   :  { %1333 = vrsqrt.f32 %v558_v17  ;;  %vm566_vm13 = vweird.f32 %v558_v17 }
 0x21b   :  { %v422_v29 = vpop.permute.xlu2 %421 }
 0x21e   :  { %v1334_v18 = vpop.eup %1333 }
 0x21f   :  { %v561_v19 = vmul.f32 %v1334_v18, %v558_v17  ;;  %vm567_vm12 = vweird.f32 %v1334_v18 }
 0x220   :  { %vm568_vm14 = vmor %vm566_vm13, %vm567_vm12 }
 0x221   :  { %v562_v20 = vmul.f32 %v1334_v18, %v561_v19 }
 0x223   :  { %v563_v21 = vmul.f32 0.5, %v562_v20 }
 0x225   :  { %v564_v22 = vsub.f32 1.5, %v563_v21 }
 0x227   :  { %v565_v10 = vmul.f32 %v1334_v18, %v564_v22 }
 0x229   :  { %v569_v24 = vsel %vm568_vm14, %v1334_v18, %v565_v10 }
 0x22a   :  { %v580_v25 = vmul.f32 %v569_v24, %v556_v23  ;;  %v1809_v23 = vld [vmem:[#allocation3 + $0x6] ss:$8 sm:$0xf] }
 0x22b   :  { %v918_v10 = vperm.slane %v1809_v23, 2 }
 0x22c   :  { %590 = vperm.xlu1 %1328, %v580_v25   ;;  %v584_v27 = vmul.f32 %v580_v25, %v530_v46  ;;  %v1787_v46 = vld [vmem:[#allocation3 + $0x7] ss:$8 sm:$0xf] }
 0x22d   :  { %v968_v15 = vperm.slane %v1787_v46, 2  ;;  %v969_v47 = vperm.slane %v1787_v46, 3 }
 0x22e   :  { %v586_v28 = vsub.f32 %v582_v26, %v584_v27 }
 0x230   :  { %608 = vperm.xlu2 %1329, %v586_v28   ;;  %v1824_v28 = vld [vmem:[#allocation3 + $0x5] ss:$8 sm:$0xf] }
 0x25c   :  { %v485_v34 = vpop.f32.mrf.mxu2 }
 0x25d   :  { %v505_v35 = vpop.f32.mrf.mxu3  ;;  %v1689_v36 = vadd.f32 %v485_v34, %v422_v29 }
 0x25e   :  { %v1691_v37 = vadd.f32 %v505_v35, %v422_v29 }
 0x25f   :  { %510 = vst [vmem:[#allocation6 + $0x30] sm:$0xff] %v1689_v36  ;;  %v538_v59 = vmul.f32 %v1689_v36, %v1689_v36 }
 0x260   :  { %511 = vst [vmem:[#allocation6 + $0x38] sm:$0xff] %v1691_v37  ;;  %v539_v62 = vmul.f32 %v1691_v37, %v1691_v37 }
 0x266   :  { %v445_v30 = vpop.f32.mrf.mxu0  ;;  %v465_v31 = vpop.f32.mrf.mxu1 }
 0x267   :  { %v1683_v32 = vadd.f32 %v445_v30, %v422_v29  ;;  %v1685_v33 = vadd.f32 %v465_v31, %v422_v29  ;;  %v868_v30 = vperm.slane %v1824_v28, 2 }
 0x269   :  { %508 = vst [vmem:[#allocation6 + $0x20] sm:$0xff] %v1683_v32  ;;  %v536_v57 = vmul.f32 %v1683_v32, %v1683_v32  ;;  %v537_v58 = vmul.f32 %v1685_v33, %v1685_v33 }
 0x26a   :  { %509 = vst [vmem:[#allocation6 + $0x28] sm:$0xff] %v1685_v33 }
 0x26b   :  { %v545_v60 = vadd.f32 %v537_v58, %v536_v57 }
 0x26d   :  { %v546_v63 = vadd.f32 %v545_v60, %v538_v59 }
 0x26f   :  { %v547_v3 = vadd.f32 %v546_v63, %v539_v62 }
 0x28a   :  { %v609_v43 = vpop.permute.xlu2 %608 }
 0x29e   :  { %v591_v38 = vpop.permute.xlu1 %590 }
 0x29f   :  { %v599_v39 = vmul.f32 %v591_v38, %v1471_v1  ;;  %v600_v42 = vmul.f32 %v591_v38, %v1476_v2  ;;  %v598_v48 = vmul.f32 %v591_v38, %v1466_v0  ;;  %v601_v52 = vmul.f32 %v591_v38, %v1488_v6 }
 0x2a0   :  { %v525_v6 = vadd.f32 %v1685_v33, %v1683_v32 }
 0x2a1   :  { %v617_v44 = vadd.f32 %v609_v43, %v599_v39  ;;  %v618_v45 = vadd.f32 %v609_v43, %v600_v42  ;;  %v616_v1 = vadd.f32 %v609_v43, %v598_v48  ;;  %v619_v0 = vadd.f32 %v609_v43, %v601_v52 }
 0x2a2   :  { %v526_v54 = vadd.f32 %v525_v6, %v1689_v36 }
 0x2a3   :  { %v1698_v49 = vmax.f32 %v617_v44, 0.0  ;;  %v1700_v51 = vmax.f32 %v618_v45, 0.0  ;;  %v1708_v2 = vmax.f32 %v616_v1, 0.0  ;;  %v1717_v53 = vmax.f32 %v619_v0, 0.0 }
 0x2a4   :  { %v527_v55 = vadd.f32 %v526_v54, %v1691_v37  ;;  %v1850_v1 = vld [vmem:[#allocation3 + $0x2] ss:$8 sm:$0xf] }
 0x2a5   :  { %948 = vrot.lane.b32.xlu2 %v1700_v51, %s1393_s2  ;;  %844 = vrot.lane.b32.xlu0 %v1698_v49, %s1396_s11  ;;  %v760_v52 = vperm.slane %v1850_v1, 2 }
 0x2a6   :  { %944 = vrot.lane.b32.xlu1 %v1698_v49, %s1393_s2 }
 0x2ad   :  { %894 = vrot.lane.b32.xlu2 %v1698_v49, %s1395_s30  ;;  %782 = vrot.lane.b32.xlu0 %v1708_v2, %s1397_s12 }
 0x2ae   :  { %898 = vrot.lane.b32.xlu1 %v1700_v51, %s1395_s30 }
 0x2b5   :  { %940 = vrot.lane.b32.xlu2 %v1708_v2, %s1393_s2 }
 0x2b6   :  { %952 = vrot.lane.b32.xlu1 %v1717_v53, %s1393_s2 }
 0x2bd   :  { %848 = vrot.lane.b32.xlu2 %v1700_v51, %s1396_s11 }
 0x2be   :  { %902 = vrot.lane.b32.xlu1 %v1717_v53, %s1395_s30 }
 0x2c5   :  { %890 = vrot.lane.b32.xlu2 %v1708_v2, %s1395_s30 }
 0x2c6   :  { %852 = vrot.lane.b32.xlu1 %v1717_v53, %s1396_s11 }
 0x2cd   :  { %840 = vrot.lane.b32.xlu2 %v1708_v2, %s1396_s11 }
 0x2ce   :  { %736 = vrot.lane.b32.xlu1 %v1698_v49, %s1398_s13 }
 0x2d5   :  { %786 = vrot.lane.b32.xlu2 %v1698_v49, %s1397_s12 }
 0x2d6   :  { %794 = vrot.lane.b32.xlu1 %v1717_v53, %s1397_s12 }
 0x2d7   :  { %528 = vadd.xlane.f32.xlu0 %v527_v55 }
 0x2dd   :  { %732 = vrot.lane.b32.xlu2 %v1708_v2, %s1398_s13 }
 0x2de   :  { %740 = vrot.lane.b32.xlu1 %v1700_v51, %s1398_s13 }
 0x2e6   :  { %1002 = vrot.lane.b32.xlu1 %v1717_v53, %s1394_s3 }
 0x2eb   :  { %682 = vrot.lane.b32.xlu0 %v1708_v2, %s1399_s14 }
 0x2ee   :  { %694 = vrot.lane.b32.xlu1 %v1717_v53, %s1399_s14 }
 0x2f3   :  { %744 = vrot.lane.b32.xlu0 %v1717_v53, %s1398_s13 }
 0x2fb   :  { %632 = vrot.lane.b32.xlu0 %v1708_v2, %s1400_s15 }
 0x2ff   :  { %v949_v61 = vpop.permute.xlu2 %948 }
 0x306   :  { %548 = vadd.xlane.f32.xlu2 %v547_v3 }
 0x307   :  { %v895_v40 = vpop.permute.xlu2 %894 }
 0x30f   :  { %v941_v4 = vpop.permute.xlu2 %940 }
 0x317   :  { %v845_v5 = vpop.permute.xlu0 %844  ;;  %v849_v7 = vpop.permute.xlu2 %848 }
 0x318   :  { %v945_v8 = vpop.permute.xlu1 %944  ;;  %v1767_v56 = vsel %vm261_vm6, %v845_v5, %v849_v7 }
 0x319   :  { %v1771_v9 = vsel %vm325_vm4, %v945_v8, %v949_v61  ;;  %v1775_v11 = vsel %vm325_vm4, %v941_v4, %v945_v8 }
 0x31e   :  { %790 = vrot.lane.b32.xlu2 %v1700_v51, %s1397_s12 }
 0x31f   :  { %v891_v12 = vpop.permute.xlu2 %890  ;;  %v1843_v44 = vpop.permute.xlu0 %782 }
 0x320   :  { %v899_v13 = vpop.permute.xlu1 %898  ;;  %v1781_v14 = vsel %vm293_vm5, %v891_v12, %v895_v40 }
 0x321   :  { %v1785_v41 = vsel %vm293_vm5, %v895_v40, %v899_v13 }
 0x326   :  { %686 = vrot.lane.b32.xlu2 %v1698_v49, %s1399_s14 }
 0x327   :  { %v841_v16 = vpop.permute.xlu2 %840 }
 0x328   :  { %v953_v17 = vpop.permute.xlu1 %952  ;;  %v1795_v18 = vsel %vm261_vm6, %v841_v16, %v845_v5 }
 0x329   :  { %v956_v19 = vsel %vm325_vm4, %v949_v61, %v953_v17  ;;  %v962_v20 = vsel %vm325_vm4, %v953_v17, %v941_v4 }
 0x32a   :  { %v1803_v21 = vmul.f32 %v968_v15, %v956_v19  ;;  %v1807_v22 = vmul.f32 %v969_v47, %v962_v20  ;;  %v557_v19 = vld [vmem:[%s2288_s6 + $0x8] sm:$0xff] }
 0x32e   :  { %998 = vrot.lane.b32.xlu2 %v1700_v51, %s1394_s3 }
 0x32f   :  { %v1826_v29 = vpop.permute.xlu2 %786 }
 0x330   :  { %v903_v24 = vpop.permute.xlu1 %902 }
 0x331   :  { %v906_v25 = vsel %vm293_vm5, %v899_v13, %v903_v24  ;;  %v1818_v26 = vsel %vm293_vm5, %v903_v24, %v891_v12 }
 0x332   :  { %v1822_v27 = vmul.f32 %v918_v10, %v906_v25 }
 0x337   :  { %v733_v39 = vpop.permute.xlu2 %732 }
 0x338   :  { %v853_v31 = vpop.permute.xlu1 %852 }
 0x339   :  { %v856_v34 = vsel %vm261_vm6, %v849_v7, %v853_v31  ;;  %v1833_v35 = vsel %vm261_vm6, %v853_v31, %v841_v16  ;;  %v583_v31 = vld [vmem:[%s2289_s7 + $0x8] sm:$0xff] }
 0x33a   :  { %v1837_v38 = vmul.f32 %v868_v30, %v856_v34 }
 0x340   :  { %v737_v42 = vpop.permute.xlu1 %736 }
 0x341   :  { %v1841_v43 = vsel %vm193_vm8, %v733_v39, %v737_v42 }
 0x348   :  { %v795_v45 = vpop.permute.xlu1 %794 }
 0x349   :  { %v1848_v48 = vsel %vm225_vm7, %v795_v45, %v1843_v44 }
 0x34a   :  { %v529_v55 = vpop.xlane.xlu0 %528 }
 0x34b   :  { %v531_v61 = vmul.f32 0.001953125, %v529_v55 }
 0x34d   :  { %v553_v63 = vmul.f32 %v531_v61, %v531_v61 }
 0x350   :  { %v741_v0 = vpop.permute.xlu1 %740 }
 0x351   :  { %v750_v6 = vsel %vm193_vm8, %v737_v42, %v741_v0 }
 0x352   :  { %v1857_v54 = vmul.f32 %v760_v52, %v750_v6 }
 0x354   :  { %2294 = vst [vmem:[#allocation9_spill] sm:$0xff] %v1857_v54 }
 0x35d   :  { %v1859_v57 = vpop.permute.xlu0 %682 }
 0x365   :  { %v745_v58 = vpop.permute.xlu0 %744 }
 0x366   :  { %v1863_v59 = vsel %vm193_vm8, %v741_v0, %v745_v58  ;;  %v1867_v60 = vsel %vm193_vm8, %v745_v58, %v733_v39 }
 0x36d   :  { %v1892_v0 = vpop.permute.xlu0 %632 }
 0x379   :  { %v549_v62 = vpop.xlane.xlu2 %548 }
 0x37a   :  { %v551_v3 = vmul.f32 0.001953125, %v549_v62 }
 0x37c   :  { %v555_v40 = vsub.f32 %v551_v3, %v553_v63 }
 0x37e   :  { %v559_v4 = vadd.f32 1e-05, %v555_v40 }
 0x380   :  { %1335 = vrsqrt.f32 %v559_v4  ;;  %vm576_vm0 = vweird.f32 %v559_v4 }
 0x381   :  { %v1869_v5 = vpop.permute.xlu2 %790 }
 0x382   :  { %v1874_v7 = vsel %vm225_vm7, %v1869_v5, %v795_v45 }
 0x386   :  { %v1336_v8 = vpop.eup %1335 }
 0x387   :  { %v571_v12 = vmul.f32 %v1336_v8, %v559_v4  ;;  %vm577_vm15 = vweird.f32 %v1336_v8 }
 0x388   :  { %vm578_vm1 = vmor %vm576_vm0, %vm577_vm15 }
 0x389   :  { %v572_v13 = vmul.f32 %v1336_v8, %v571_v12  ;;  %v1888_v42 = vpop.permute.xlu2 %686 }
 0x38a   :  { %2295 = vst [vmem:[#allocation10_spill] sm:$0xff] %v1888_v42 }
 0x38b   :  { %v573_v16 = vmul.f32 0.5, %v572_v13 }
 0x38d   :  { %v574_v17 = vsub.f32 1.5, %v573_v16 }
 0x38f   :  { %v575_v20 = vmul.f32 %v1336_v8, %v574_v17 }
 0x391   :  { %v579_v24 = vsel %vm578_vm1, %v1336_v8, %v575_v20  ;;  %v1890_v45 = vpop.permute.xlu2 %998  ;;  %v1981_v20 = vpop.permute.xlu1 %1002 }
 0x392   :  { %v581_v25 = vmul.f32 %v579_v24, %v557_v19  ;;  %v1114_v19 = vld [vmem:[%s2291_s9] sm:$0xff] }
 0x394   :  { %595 = vperm.xlu2 %1329, %v581_v25   ;;  %v585_v34 = vmul.f32 %v581_v25, %v531_v61 }
 0x396   :  { %v587_v39 = vsub.f32 %v583_v31, %v585_v34 }
 0x398   :  { %613 = vperm.xlu0 %1330, %v587_v39  }
 0x399   :  { %v1994_v34 = vpop.permute.xlu1 %694 }
 0x39c   :  { %636 = vrot.lane.b32.xlu2 %v1698_v49, %s1400_s15 }
 0x3a4   :  { %690 = vrot.lane.b32.xlu2 %v1700_v51, %s1399_s14 }
 0x3ac   :  { %990 = vrot.lane.b32.xlu2 %v1708_v2, %s1394_s3 }
 0x3ee   :  { %v596_v6 = vpop.permute.xlu2 %595 }
 0x3ef   :  { %v603_v55 = vmul.f32 %v596_v6, %v1685_v33  ;;  %v604_v58 = vmul.f32 %v596_v6, %v1689_v36  ;;  %v602_v4 = vmul.f32 %v596_v6, %v1683_v32  ;;  %v605_v8 = vmul.f32 %v596_v6, %v1691_v37 }
 0x3f6   :  { %v1954_v32 = vpop.permute.xlu2 %636 }
 0x3fe   :  { %v1960_v37 = vpop.permute.xlu2 %690 }
 0x406   :  { %v1970_v16 = vpop.permute.xlu2 %990 }
 0x40a   :  { %v614_v61 = vpop.permute.xlu0 %613 }
 0x40b   :  { %v621_v62 = vadd.f32 %v614_v61, %v603_v55  ;;  %v622_v63 = vadd.f32 %v614_v61, %v604_v58  ;;  %v620_v33 = vadd.f32 %v614_v61, %v602_v4  ;;  %v623_v36 = vadd.f32 %v614_v61, %v605_v8 }
 0x40c   :  { %v967_v55 = vperm.slane %v1787_v46, 1 }
 0x40d   :  { %v1896_v3 = vmax.f32 %v621_v62, 0.0  ;;  %v1898_v40 = vmax.f32 %v622_v63, 0.0  ;;  %v1908_v12 = vmax.f32 %v620_v33, 0.0  ;;  %v1910_v13 = vmax.f32 %v623_v36, 0.0 }
 0x40e   :  { %v966_v63 = vperm.slane %v1787_v46, 0  ;;  %v917_v33 = vperm.slane %v1809_v23, 1  ;;  %v2131_v46 = vld [vmem:[%s2290_s8 + $0x8] sm:$0xff] }
 0x40f   :  { %900 = vrot.lane.b32.xlu0 %v1898_v40, %s1395_s30  ;;  %950 = vrot.lane.b32.xlu2 %v1898_v40, %s1393_s2 }
 0x410   :  { %946 = vrot.lane.b32.xlu1 %v1896_v3, %s1393_s2 }
 0x417   :  { %954 = vrot.lane.b32.xlu2 %v1910_v13, %s1393_s2  ;;  %942 = vrot.lane.b32.xlu0 %v1908_v12, %s1393_s2 }
 0x418   :  { %896 = vrot.lane.b32.xlu1 %v1896_v3, %s1395_s30 }
 0x41f   :  { %854 = vrot.lane.b32.xlu2 %v1910_v13, %s1396_s11  ;;  %850 = vrot.lane.b32.xlu0 %v1898_v40, %s1396_s11 }
 0x420   :  { %846 = vrot.lane.b32.xlu1 %v1896_v3, %s1396_s11 }
 0x427   :  { %796 = vrot.lane.b32.xlu2 %v1910_v13, %s1397_s12  ;;  %904 = vrot.lane.b32.xlu0 %v1910_v13, %s1395_s30 }
 0x428   :  { %892 = vrot.lane.b32.xlu1 %v1908_v12, %s1395_s30  ;;  %s1294_s30 = sshll.u32 %s2292_s10, 4  ;;  %s1295_s30 = int_to_ptr.hbm [resolvable:$true] %s1294_s30 }
 0x42f   :  { %1000 = vrot.lane.b32.xlu2 %v1898_v40, %s1394_s3  ;;  %842 = vrot.lane.b32.xlu0 %v1908_v12, %s1396_s11 }
 0x430   :  { %784 = vrot.lane.b32.xlu1 %v1908_v12, %s1397_s12 }
 0x437   :  { %638 = vrot.lane.b32.xlu2 %v1896_v3, %s1400_s15  ;;  %788 = vrot.lane.b32.xlu0 %v1896_v3, %s1397_s12 }
 0x438   :  { %734 = vrot.lane.b32.xlu1 %v1908_v12, %s1398_s13 }
 0x43f   :  { %996 = vrot.lane.b32.xlu2 %v1896_v3, %s1394_s3  ;;  %738 = vrot.lane.b32.xlu0 %v1896_v3, %s1398_s13 }
 0x440   :  { %684 = vrot.lane.b32.xlu1 %v1908_v12, %s1399_s14 }
 0x447   :  { %644 = vrot.lane.b32.xlu2 %v1717_v53, %s1400_s15  ;;  %792 = vrot.lane.b32.xlu0 %v1898_v40, %s1397_s12 }
 0x448   :  { %742 = vrot.lane.b32.xlu1 %v1898_v40, %s1398_s13 }
 0x44f   :  { %688 = vrot.lane.b32.xlu0 %v1896_v3, %s1399_s14 }
 0x450   :  { %1004 = vrot.lane.b32.xlu1 %v1910_v13, %s1394_s3 }
 0x457   :  { %746 = vrot.lane.b32.xlu0 %v1910_v13, %s1398_s13 }
 0x458   :  { %692 = vrot.lane.b32.xlu1 %v1898_v40, %s1399_s14 }
 0x45f   :  { %634 = vrot.lane.b32.xlu0 %v1908_v12, %s1400_s15 }
 0x460   :  { %642 = vrot.lane.b32.xlu1 %v1898_v40, %s1400_s15 }
 0x467   :  { %696 = vrot.lane.b32.xlu0 %v1910_v13, %s1399_s14 }
 0x468   :  { %994 = vrot.lane.b32.xlu1 %v1698_v49, %s1394_s3 }
 0x469   :  { %v951_v17 = vpop.permute.xlu2 %950 }
 0x46f   :  { %992 = vrot.lane.b32.xlu0 %v1908_v12, %s1394_s3 }
 0x470   :  { %1117 = vperm.xlu1 %1328, %v1114_v19  }
 0x471   :  { %v1983_v24 = vpop.permute.xlu2 %954 }
 0x472   :  { %v957_v25 = vsel %vm325_vm4, %v951_v17, %v1983_v24 }
 0x473   :  { %v1990_v31 = vmul.f32 %v968_v15, %v957_v25  ;;  %v975_v15 = vmul.f32 %v967_v55, %v1771_v9  ;;  %v974_v9 = vmul.f32 %v966_v63, %v1775_v11  ;;  %v925_v25 = vmul.f32 %v917_v33, %v1785_v41 }
 0x477   :  { %646 = vrot.lane.b32.xlu0 %v1910_v13, %s1400_s15 }
 0x47f   :  { %640 = vrot.lane.b32.xlu0 %v1700_v51, %s1400_s15 }
 0x481   :  { %v901_v39 = vpop.permute.xlu0 %900 }
 0x482   :  { %v947_v6 = vpop.permute.xlu1 %946 }
 0x483   :  { %v959_v58 = vsel %vm325_vm4, %v947_v6, %v951_v17 }
 0x484   :  { %v979_v61 = vmul.f32 %v967_v55, %v959_v58  ;;  %v2013_v55 = vpop.permute.xlu2 %854 }
 0x486   :  { %1164 = vmatpush.msrb.mxu2 %v979_v61 }
 0x488   :  { %1165 = vmatpush.msrb.mxu2 %v975_v15  ;;  %v867_v15 = vperm.slane %v1824_v28, 1 }
 0x489   :  { %v2002_v62 = vpop.permute.xlu0 %942 }
 0x48a   :  { %v897_v4 = vpop.permute.xlu1 %896  ;;  %v961_v8 = vsel %vm325_vm4, %v2002_v62, %v947_v6 }
 0x48b   :  { %v909_v36 = vsel %vm293_vm5, %v897_v4, %v901_v39  ;;  %v978_v17 = vmul.f32 %v966_v63, %v961_v8  ;;  %v875_v63 = vmul.f32 %v867_v15, %v1767_v56 }
 0x48c   :  { %v929_v19 = vmul.f32 %v917_v33, %v909_v36 }
 0x48d   :  { %1124 = vmatpush.msrb.mxu0 %v978_v17 }
 0x48e   :  { %1166 = vmatpush.msrb.mxu2 %v929_v19  ;;  %v916_v19 = vperm.slane %v1809_v23, 0 }
 0x48f   :  { %1125 = vmatpush.msrb.mxu0 %v974_v9 }
 0x490   :  { %1167 = vmatpush.msrb.mxu2 %v925_v25  ;;  %v924_v25 = vmul.f32 %v916_v19, %v1781_v14 }
 0x491   :  { %v851_v58 = vpop.permute.xlu0 %850 }
 0x492   :  { %v847_v61 = vpop.permute.xlu1 %846  ;;  %v857_v6 = vsel %vm261_vm6, %v851_v58, %v2013_v55 }
 0x493   :  { %v859_v8 = vsel %vm261_vm6, %v847_v61, %v851_v58  ;;  %v2023_v11 = vmul.f32 %v868_v30, %v857_v6 }
 0x494   :  { %v879_v41 = vmul.f32 %v867_v15, %v859_v8  ;;  %v2051_v15 = vld [vmem:[#allocation3 + $0x3] ss:$8 sm:$0xf] }
 0x496   :  { %1168 = vmatpush.msrb.mxu2 %v879_v41  ;;  %v808_v41 = vperm.slane %v2051_v15, 0 }
 0x498   :  { %1169 = vmatpush.msrb.mxu2 %v875_v63 }
 0x499   :  { %v2026_v33 = vpop.permute.xlu0 %904 }
 0x49a   :  { %v2028_v36 = vpop.permute.xlu1 %892  ;;  %v907_v17 = vsel %vm293_vm5, %v901_v39, %v2026_v33  ;;  %1170 = vmatpush.msrb.mxu2 %v1896_v3  ;;  %v866_v3 = vperm.slane %v1824_v28, 0 }
 0x49b   :  { %v911_v30 = vsel %vm293_vm5, %v2028_v36, %v897_v4  ;;  %v2040_v56 = vmul.f32 %v918_v10, %v907_v17 }
 0x49c   :  { %1171 = vmatpush.msrb.mxu2 %v1698_v49  ;;  %v928_v9 = vmul.f32 %v916_v19, %v911_v30  ;;  %v874_v10 = vmul.f32 %v866_v3, %v1795_v18  ;;  %v2053_v49 = vpop.permute.xlu2 %796  ;;  %v802_v18 = vsel %vm225_vm7, %v1843_v44, %v1826_v29  ;;  %v816_v30 = vmul.f32 %v808_v41, %v1848_v48 }
 0x49e   :  { %1126 = vmatpush.msrb.mxu0 %v928_v9 }
 0x4a0   :  { %1127 = vmatpush.msrb.mxu0 %v924_v25 }
 0x4a1   :  { %v2044_v39 = vpop.permute.xlu0 %842 }
 0x4a2   :  { %v785_v58 = vpop.permute.xlu1 %784  ;;  %v861_v4 = vsel %vm261_vm6, %v2044_v39, %v847_v61  ;;  %v809_v61 = vperm.slane %v2051_v15, 1 }
 0x4a3   :  { %v878_v6 = vmul.f32 %v866_v3, %v861_v4  ;;  %v805_v14 = vsel %vm225_vm7, %v2053_v49, %v785_v58  ;;  %v759_v3 = vperm.slane %v1850_v1, 1 }
 0x4a4   :  { %v820_v19 = vmul.f32 %v808_v41, %v805_v14  ;;  %v817_v9 = vmul.f32 %v809_v61, %v802_v18  ;;  %v1001_v41 = vpop.permute.xlu2 %1000  ;;  %v2091_v18 = vld [vmem:[#allocation3 + $0x1] ss:$8 sm:$0xf] }
 0x4a5   :  { %1128 = vmatpush.msrb.mxu0 %v878_v6 }
 0x4a7   :  { %1129 = vmatpush.msrb.mxu0 %v874_v10 }
 0x4a9   :  { %1130 = vmatpush.msrb.mxu0 %v1908_v12  ;;  %v2059_v8 = vpop.permute.xlu0 %788 }
 0x4aa   :  { %v735_v63 = vpop.permute.xlu1 %734  ;;  %v803_v17 = vsel %vm225_vm7, %v785_v58, %v2059_v8 }
 0x4ab   :  { %1131 = vmatpush.msrb.mxu0 %v1708_v2  ;;  %v821_v12 = vmul.f32 %v809_v61, %v803_v17  ;;  %v767_v2 = vmul.f32 %v759_v3, %v1841_v43  ;;  %v2089_v61 = vld [vmem:[#allocation3 + $0x20] ss:$8 sm:$0xf]  ;;  %v709_v43 = vperm.slane %v2091_v18, 1 }
 0x4ad   :  { %1132 = vmatpush.msrb.mxu0 %v820_v19  ;;  %1172 = vmatpush.msrb.mxu2 %v821_v12  ;;  %v702_v19 = vsel %vm161_vm9, %v1859_v57, %v1888_v42  ;;  %v2120_v42 = vpop.permute.xlu2 %638 }
 0x4af   :  { %1133 = vmatpush.msrb.mxu0 %v816_v30  ;;  %1173 = vmatpush.msrb.mxu2 %v817_v9  ;;  %v1018_v30 = vperm.slane %v2089_v61, 2  ;;  %v1006_v9 = vsel %vm357_vm3, %v1890_v45, %v1981_v20 }
 0x4b1   :  { %v739_v25 = vpop.permute.xlu0 %738 }
 0x4b2   :  { %v2073_v44 = vpop.permute.xlu1 %684  ;;  %v753_v4 = vsel %vm193_vm8, %v735_v63, %v739_v25 }
 0x4b3   :  { %v771_v58 = vmul.f32 %v759_v3, %v753_v4  ;;  %v963_v4 = vsel %vm325_vm4, %v1983_v24, %v2002_v62  ;;  %v758_v62 = vperm.slane %v1850_v1, 0 }
 0x4b4   :  { %v981_v54 = vmul.f32 %v969_v47, %v963_v4 }
 0x4b5   :  { %1174 = vmatpush.msrb.mxu2 %v771_v58 }
 0x4b7   :  { %1175 = vmatpush.msrb.mxu2 %v767_v2  ;;  %v717_v2 = vmul.f32 %v709_v43, %v702_v19  ;;  %v869_v19 = vperm.slane %v1824_v28, 3 }
 0x4b9   :  { %v2078_v6 = vpop.permute.xlu0 %792 }
 0x4ba   :  { %v2080_v10 = vpop.permute.xlu1 %742  ;;  %v799_v4 = vsel %vm225_vm7, %v2078_v6, %v2053_v49 }
 0x4bb   :  { %v751_v48 = vsel %vm193_vm8, %v739_v25, %v2080_v10 }
 0x4bc   :  { %v2087_v14 = vmul.f32 %v760_v52, %v751_v48  ;;  %v1026_v48 = vmul.f32 %v1018_v30, %v1006_v9 }
 0x4be   :  { %2296 = vst [vmem:[#allocation11_spill] sm:$0xff] %v2087_v14  ;;  %v919_v14 = vperm.slane %v1809_v23, 3 }
 0x4c1   :  { %v2093_v17 = vpop.permute.xlu0 %688 }
 0x4c2   :  { %v2100_v12 = vpop.permute.xlu1 %1004  ;;  %v703_v52 = vsel %vm161_vm9, %v2073_v44, %v2093_v17 }
 0x4c3   :  { %v1007_v25 = vsel %vm357_vm3, %v1001_v41, %v2100_v12  ;;  %v721_v3 = vmul.f32 %v709_v43, %v703_v52  ;;  %v913_v52 = vsel %vm293_vm5, %v2026_v33, %v2028_v36  ;;  %v927_v36 = vmul.f32 %v919_v14, %v1818_v26 }
 0x4c4   :  { %v1030_v58 = vmul.f32 %v1018_v30, %v1007_v25  ;;  %v931_v33 = vmul.f32 %v919_v14, %v913_v52  ;;  %v2147_v30 = vld [vmem:[#allocation3] ss:$8 sm:$0xf]  ;;  %v997_v25 = vpop.permute.xlu2 %996  ;;  %v652_v26 = vsel %vm130_vm10, %v1892_v0, %v1954_v32 }
 0x4c5   :  { %1176 = vmatpush.msrb.mxu2 %v721_v3  ;;  %v1009_v14 = vsel %vm357_vm3, %v997_v25, %v1001_v41 }
 0x4c6   :  { %1238 = vmatpush.msrb.mxu3 %v1030_v58  ;;  %v811_v58 = vperm.slane %v2051_v15, 3 }
 0x4c7   :  { %1177 = vmatpush.msrb.mxu2 %v717_v2 }
 0x4c8   :  { %1239 = vmatpush.msrb.mxu3 %v1026_v48  ;;  %v2175_v48 = vld [vmem:[%s2290_s8] sm:$0xff]  ;;  %v819_v41 = vmul.f32 %v811_v58, %v1874_v7  ;;  %s1401_s8 = smov [#allocation6]  }
 0x4c9   :  { %v747_v24 = vpop.permute.xlu0 %746  ;;  %1313 = vmatmul.msk.f32.vlgmr.msrb.gmra.mxu3 %vm1120_vm2, %v2131_v46  ;;  %s1292_s29 = sshll.u32 %s1401_s8, 4  ;;  %s1293_s29 = int_to_ptr.vmem [resolvable:$true] %s1292_s29 }
 0x4ca   :  { %1244 = vmatpush.msra.mxu3 %v981_v54  ;;  %v2133_v47 = vpop.permute.xlu1 %692  ;;  %v755_v43 = vsel %vm193_vm8, %v747_v24, %v735_v63  ;;  %v863_v54 = vsel %vm261_vm6, %v2013_v55, %v2044_v39  ;;  %v766_v63 = vmul.f32 %v758_v62, %v1867_v60  ;;  %v659_v55 = vperm.slane %v2147_v30, 1 }
 0x4cb   :  { %v770_v23 = vmul.f32 %v758_v62, %v755_v43  ;;  %v881_v9 = vmul.f32 %v869_v19, %v863_v54  ;;  %v823_v62 = vmul.f32 %v811_v58, %v799_v4  ;;  %v749_v49 = vsel %vm193_vm8, %v2080_v10, %v747_v24 }
 0x4cc   :  { %1245 = vmatpush.msra.mxu3 %v1807_v22  ;;  %v877_v22 = vmul.f32 %v869_v19, %v1833_v35  ;;  %v1017_v35 = vperm.slane %v2089_v61, 1  ;;  %v667_v2 = vmul.f32 %v659_v55, %v652_v26  ;;  %v658_v4 = vperm.slane %v2147_v30, 0 }
 0x4cd   :  { %1134 = vmatpush.msrb.mxu0 %v770_v23 }
 0x4ce   :  { %1246 = vmatpush.msra.mxu3 %v931_v33  ;;  %v1029_v52 = vmul.f32 %v1017_v35, %v1009_v14  ;;  %v708_v33 = vperm.slane %v2091_v18, 0 }
 0x4cf   :  { %1135 = vmatpush.msrb.mxu0 %v766_v63 }
 0x4d0   :  { %1247 = vmatpush.msra.mxu3 %v927_v36 }
 0x4d1   :  { %v2150_v3 = vpop.permute.xlu0 %634 }
 0x4d2   :  { %1248 = vmatpush.msra.mxu3 %v881_v9  ;;  %v2157_v28 = vpop.permute.xlu1 %642  ;;  %v653_v60 = vsel %vm130_vm10, %v2150_v3, %v2120_v42 }
 0x4d3   :  { %v671_v39 = vmul.f32 %v659_v55, %v653_v60 }
 0x4d4   :  { %1249 = vmatpush.msra.mxu3 %v877_v22  ;;  %v1016_v22 = vperm.slane %v2089_v61, 0 }
 0x4d5   :  { %1178 = vmatpush.msrb.mxu2 %v671_v39  ;;  %v661_v39 = vperm.slane %v2147_v30, 3 }
 0x4d6   :  { %1250 = vmatpush.msra.mxu3 %v1910_v13  ;;  %v761_v13 = vperm.slane %v1850_v1, 3 }
 0x4d7   :  { %1179 = vmatpush.msrb.mxu2 %v667_v2 }
 0x4d8   :  { %1251 = vmatpush.msra.mxu3 %v1717_v53  ;;  %1180 = vmatmul.f32.vlgmr.msrb.gmra.mxu2 %v2175_v48  ;;  %v704_v53 = vsel %vm161_vm9, %v1994_v34, %v1859_v57  ;;  %v773_v24 = vmul.f32 %v761_v13, %v749_v49  ;;  %v769_v19 = vmul.f32 %v761_v13, %v1863_v59  ;;  %v711_v57 = vperm.slane %v2091_v18, 3 }
 0x4d9   :  { %1198 = vmatpush.msra.mxu2 %v1029_v52  ;;  %v697_v43 = vpop.permute.xlu0 %696  ;;  %v716_v63 = vmul.f32 %v708_v33, %v704_v53 }
 0x4da   :  { %1252 = vmatpush.msra.mxu3 %v823_v62  ;;  %v995_v23 = vpop.permute.xlu1 %994  ;;  %v705_v10 = vsel %vm161_vm9, %v697_v43, %v2073_v44  ;;  %v699_v36 = vsel %vm161_vm9, %v2133_v47, %v697_v43  ;;  %v698_v44 = vsel %vm161_vm9, %v1960_v37, %v1994_v34 }
 0x4db   :  { %v1008_v1 = vsel %vm357_vm3, %v995_v23, %v1890_v45  ;;  %v720_v7 = vmul.f32 %v708_v33, %v705_v10  ;;  %v723_v45 = vmul.f32 %v711_v57, %v699_v36  ;;  %v719_v9 = vmul.f32 %v711_v57, %v698_v44 }
 0x4dc   :  { %1253 = vmatpush.msra.mxu3 %v819_v41  ;;  %v1025_v54 = vmul.f32 %v1017_v35, %v1008_v1  ;;  %v1010_v55 = vsel %vm357_vm3, %v1970_v16, %v995_v23  ;;  %v645_v35 = vpop.permute.xlu2 %644  ;;  %v2299_v41 = vld [vmem:[#allocation9_spill] sm:$0xff] }
 0x4dd   :  { %1136 = vmatpush.msrb.mxu0 %v720_v7  ;;  %v1024_v60 = vmul.f32 %v1016_v22, %v1010_v55 }
 0x4de   :  { %1254 = vmatpush.msra.mxu3 %v773_v24  ;;  %1199 = vmatpush.msra.mxu2 %v1025_v54 }
 0x4df   :  { %1137 = vmatpush.msrb.mxu0 %v716_v63 }
 0x4e0   :  { %1255 = vmatpush.msra.mxu3 %v769_v19  ;;  %1312 = vmatmul.msk.f32.vlgmr.msra.gmra.mxu2 %vm1120_vm2, %v2131_v46 }
 0x4e1   :  { %v993_v59 = vpop.permute.xlu0 %992 }
 0x4e2   :  { %1256 = vmatpush.msra.mxu3 %v723_v45  ;;  %v1011_v26 = vsel %vm357_vm3, %v993_v59, %v997_v25  ;;  %v654_v25 = vsel %vm130_vm10, %v645_v35, %v1892_v0  ;;  %v1013_v62 = vsel %vm357_vm3, %v2100_v12, %v993_v59  ;;  %v1019_v0 = vperm.slane %v2089_v61, 3 }
 0x4e3   :  { %v1028_v34 = vmul.f32 %v1016_v22, %v1011_v26  ;;  %v666_v49 = vmul.f32 %v658_v4, %v654_v25 }
 0x4e4   :  { %1257 = vmatpush.msra.mxu3 %v719_v9 }
 0x4e5   :  { %1158 = vmatpush.msrb.mxu1 %v1028_v34 }
 0x4e7   :  { %1159 = vmatpush.msrb.mxu1 %v1024_v60 }
 0x4e8   :  { %1311 = vmatmul.msk.f32.vlgmr.msrb.gmra.mxu1 %vm1120_vm2, %v2131_v46 }
 0x4e9   :  { %1204 = vmatpush.msra.mxu1 %v1990_v31  ;;  %v647_v14 = vpop.permute.xlu0 %646 }
 0x4ea   :  { %v649_v58 = vsel %vm130_vm10, %v2157_v28, %v647_v14  ;;  %v655_v2 = vsel %vm130_vm10, %v647_v14, %v2150_v3  ;;  %v1012_v3 = vsel %vm357_vm3, %v1981_v20, %v1970_v16  ;;  %v801_v16 = vsel %vm225_vm7, %v2059_v8, %v2078_v6 }
 0x4eb   :  { %1205 = vmatpush.msra.mxu1 %v1803_v21  ;;  %v673_v31 = vmul.f32 %v661_v39, %v649_v58  ;;  %v670_v52 = vmul.f32 %v658_v4, %v655_v2  ;;  %v1031_v21 = vmul.f32 %v1019_v0, %v1013_v62  ;;  %v1027_v12 = vmul.f32 %v1019_v0, %v1012_v3 }
 0x4ec   :  { %v810_v20 = vperm.slane %v2051_v15, 2  ;;  %v710_v15 = vperm.slane %v2091_v18, 2  ;;  %v660_v6 = vperm.slane %v2147_v30, 2  ;;  %v1118_v30 = vpop.permute.xlu1 %1117 }
 0x4ed   :  { %1206 = vmatpush.msra.mxu1 %v2040_v56  ;;  %1138 = vmatpush.msrb.mxu0 %v670_v52 }
 0x4ee   :  { %1258 = vmatpush.msra.mxu3 %v673_v31  ;;  %v822_v13 = vmul.f32 %v810_v20, %v801_v16 }
 0x4ef   :  { %1207 = vmatpush.msra.mxu1 %v1822_v27  ;;  %1139 = vmatpush.msrb.mxu0 %v666_v49 }
 0x4f0   :  { %1140 = vmatmul.f32.vlgmr.msrb.gmra.mxu0 %v2175_v48 }
 0x4f1   :  { %1208 = vmatpush.msra.mxu1 %v2023_v11  ;;  %1278 = vmatpush.msra.mxu0 %v1031_v21  ;;  %v641_v56 = vpop.permute.xlu0 %640  ;;  %v800_v11 = vsel %vm225_vm7, %v1826_v29, %v1869_v5  ;;  %v2297_v29 = vld [vmem:[#allocation11_spill] sm:$0xff]  ;;  %v2298_v5 = vld [vmem:[#allocation10_spill] sm:$0xff] }
 0x4f2   :  { %v648_v61 = vsel %vm130_vm10, %v641_v56, %v645_v35  ;;  %v650_v18 = vsel %vm130_vm10, %v1954_v32, %v641_v56 }
 0x4f3   :  { %1209 = vmatpush.msra.mxu1 %v1837_v38  ;;  %v669_v27 = vmul.f32 %v661_v39, %v648_v61  ;;  %1279 = vmatpush.msra.mxu0 %v1027_v12  ;;  %v818_v38 = vmul.f32 %v810_v20, %v800_v11  ;;  %v668_v43 = vmul.f32 %v660_v6, %v650_v18 }
 0x4f5   :  { %1210 = vmatpush.msra.mxu1 %v1898_v40  ;;  %1259 = vmatpush.msra.mxu3 %v669_v27  ;;  %v701_v40 = vsel %vm161_vm9, %v2093_v17, %v2133_v47 }
 0x4f6   :  { %1260 = vmatmul.f32.vlgmr.msra.gmra.mxu3 %v2175_v48  ;;  %v722_v8 = vmul.f32 %v710_v15, %v701_v40 }
 0x4f7   :  { %1211 = vmatpush.msra.mxu1 %v1700_v51  ;;  %v700_v51 = vsel %vm161_vm9, %v2298_v5, %v1960_v37 }
 0x4f8   :  { %1314 = vmatmul.msk.f32.vlgmr.msra.gmra.mxu0 %vm1120_vm2, %v2131_v46  ;;  %v651_v46 = vsel %vm130_vm10, %v2120_v42, %v2157_v28  ;;  %v718_v17 = vmul.f32 %v710_v15, %v700_v51 }
 0x4f9   :  { %1212 = vmatpush.msra.mxu1 %v822_v13  ;;  %v672_v47 = vmul.f32 %v660_v6, %v651_v46 }
 0x4fb   :  { %1213 = vmatpush.msra.mxu1 %v818_v38 }
 0x4fd   :  { %1214 = vmatpush.msra.mxu1 %v2297_v29 }
 0x4ff   :  { %1215 = vmatpush.msra.mxu1 %v2299_v41 }
 0x501   :  { %1216 = vmatpush.msra.mxu1 %v722_v8 }
 0x503   :  { %1217 = vmatpush.msra.mxu1 %v718_v17 }
 0x505   :  { %1218 = vmatpush.msra.mxu1 %v672_v47 }
 0x507   :  { %1219 = vmatpush.msra.mxu1 %v668_v43 }
 0x508   :  { %1220 = vmatmul.f32.vlgmr.msra.gmra.mxu1 %v2175_v48 }
 0x54c   :  { %v1241_v24 = vpop.f32.mrf.mxu3 }
 0x55b   :  { %v1181_v37 = vpop.f32.mrf.mxu2 }
 0x55c   :  { %v1182_v33 = vadd.f32 %v1181_v37, %v1118_v30 }
 0x563   :  { %v1201_v53 = vpop.f32.mrf.mxu2 }
 0x564   :  { %v1202_v23 = vadd.f32 %v1201_v53, %v1182_v33 }
 0x565   :  { %v1161_v28 = vpop.f32.mrf.mxu1 }
 0x566   :  { %1285 = vst [vmem:[#allocation6 + $0x48] sm:$0xff] %v1202_v23 }
 0x56d   :  { %v1141_v42 = vpop.f32.mrf.mxu0 }
 0x56e   :  { %v1142_v10 = vadd.f32 %v1141_v42, %v1118_v30 }
 0x570   :  { %v1162_v1 = vadd.f32 %v1161_v28, %v1142_v10 }
 0x572   :  { %1284 = vst [vmem:[#allocation6 + $0x40] sm:$0xff] %v1162_v1 }
 0x575   :  { %v1281_v32 = vpop.f32.mrf.mxu0 }
 0x579   :  { %v1261_v50 = vpop.f32.mrf.mxu3 }
 0x57a   :  { %v1262_v7 = vadd.f32 %v1261_v50, %v1118_v30 }
 0x57c   :  { %v1282_v54 = vadd.f32 %v1281_v32, %v1262_v7 }
 0x57e   :  { %1287 = vst [vmem:[#allocation6 + $0x58] sm:$0xff] %v1282_v54 }
 0x585   :  { %v1221_v36 = vpop.f32.mrf.mxu1 }
 0x586   :  { %v1222_v48 = vadd.f32 %v1221_v36, %v1118_v30 }
 0x588   :  { %v1242_v19 = vadd.f32 %v1241_v24, %v1222_v48 }
 0x58a   :  { %1286 = vst [vmem:[#allocation6 + $0x50] sm:$0xff] %v1242_v19 }
 0x58b   :  { %1300 = dma.vmem_to_hbm [thread:$0]  %s1293_s29, 1536, %s1295_s30, [#allocation5], %s1390_s18, %s1390_s18, %s1391_s19  }
 0x58c   :  { %1387 = dma.done.wait [#allocation5], 1536  }
 0x58d   :  { %1388 = vsyncadd [#allocation5], 4294965760 }
 0x58e   :  { %1305 = vsyncpa [#allocation4], 1 }
 0x58f   :  { %1306 = vsyncpa [#allocation5], 1 }

</bundles_post_ra>
